<compile_context>
chip_gen: v7x
topology: tpu7x:2x2x1
jax: 0.10.0
libtpu: 0.0.40
codegen_flags: <defaults>
</compile_context>

<pallas_src>
import functools

import jax
import jax.numpy as jnp
from jax import lax
from jax.experimental import pallas as pl
from jax.experimental.pallas import tpu as pltpu

K = 5          # conv kernel size
PAD = 2        # conv padding
HID = 1024     # hidden channels (hard-coded in the PyTorch module)
NS_PAD = 128   # lane-dense padded output-channel count (per tap)


def _cnnbasic_kernel(x_ref, w1_ref, b1_ref, w2_ref, b2_ref, o_ref, *, nt, bb):
    # x_ref : (bb, nt, K*Cin)        bf16, im2col of the padded conv1 input
    # w1_ref: (K*Cin, HID)           bf16, conv1 taps folded into contraction
    # b1_ref: (1, HID)               f32
    # w2_ref: (HID, K*NS_PAD)        bf16, tap k in lanes [k*128:(k+1)*128)
    # b2_ref: (1, NS_PAD)            f32, 0-padded
    # o_ref : (bb, nt, NS_PAD)       f32, lane-dense output block
    kcin = x_ref.shape[-1]

    # ---- Conv1: one MXU matmul. M = bb*nt, K = K*Cin, N = HID ----
    x2 = x_ref[...].reshape(bb * nt, kcin)
    h = jnp.dot(x2, w1_ref[...], preferred_element_type=jnp.float32)
    h = (h + b1_ref[...]).astype(jnp.bfloat16)

    # ---- Conv2: one MXU matmul covering all K taps (N = K*128 lanes) ----
    y = jnp.dot(h, w2_ref[...], preferred_element_type=jnp.float32)
    y3 = y.reshape(bb, nt, K * NS_PAD)

    # Shift-and-add the per-tap contributions along time (conv padding PAD).
    # Pad time once with zeros; tap k's contribution to output time t is
    # y_k[t + k - PAD], i.e. yp[:, k:k+nt, k*128:(k+1)*128].
    zpad = jnp.zeros((bb, PAD, K * NS_PAD), jnp.float32)
    yp = jnp.concatenate([zpad, y3, zpad], axis=1)
    acc = yp[:, 0:nt, 0:NS_PAD]
    for k in range(1, K):
        acc = acc + yp[:, k:k + nt, k * NS_PAD:(k + 1) * NS_PAD]

    # Single full-block, lane-dense store.
    o_ref[...] = acc + b2_ref[...].reshape(1, 1, NS_PAD)


def cnnbasic_forward(m, c, p, params, *, nc, ns, nt):
    """Pallas implementation of CNNbasic.forward.

    m : (bs, ...)            -- only the batch size is used
    c : (bs, Nc, Nt, 2)      -- PyTorch layout
    p : unused
    returns (bs, Ns, Nt), matching the PyTorch output layout.
    """
    del p
    bs = m.shape[0]
    cin = nc * 2
    w1, b1, w2, b2 = params["w1"], params["b1"], params["w2"], params["b2"]

    # --- glue (plain JAX): layout plumbing only ---
    # permute(0,1,3,2) + reshape -> (bs, Nc*2, Nt); then time-major + zero pad.
    x_ncl = jnp.transpose(c, (0, 1, 3, 2)).reshape(bs, cin, nt)
    x_tm = jnp.transpose(x_ncl, (0, 2, 1))                      # (bs, Nt, Cin)
    x_pad = jnp.pad(x_tm, ((0, 0), (PAD, PAD), (0, 0)))         # (bs, Nt+4, Cin)
    # im2col: fold the K taps into the channel dim -> (bs, Nt, K*Cin).
    x_im2col = jnp.concatenate([x_pad[:, k:k + nt, :] for k in range(K)],
                               axis=-1).astype(jnp.bfloat16)

    # PyTorch conv weights are (Cout, Cin, K).
    # conv1: tap-major + flatten -> (K*Cin, HID), columns match im2col order.
    w1_flat = jnp.transpose(w1, (2, 1, 0)).reshape(K * cin, HID)
    w1_flat = w1_flat.astype(jnp.bfloat16)
    # conv2: tap-major (K, HID, Ns), pad Ns -> 128 lanes per tap, then
    # concatenate taps along the lane dim -> (HID, K*128).
    w2_t = jnp.transpose(w2, (2, 1, 0)).astype(jnp.float32)      # (K, HID, Ns)
    w2_p = jnp.zeros((K, HID, NS_PAD), jnp.float32).at[:, :, :ns].set(w2_t)
    w2_cat = jnp.transpose(w2_p, (1, 0, 2)).reshape(HID, K * NS_PAD)
    w2_cat = w2_cat.astype(jnp.bfloat16)
    b1_2d = b1.reshape(1, HID).astype(jnp.float32)
    b2_p = jnp.zeros((1, NS_PAD), jnp.float32).at[0, :ns].set(
        b2.astype(jnp.float32))

    # --- batch blocking: ~256 MXU M-rows per grid step; multiple blocks for
    #     large batches shard across v7x's TensorCores via "parallel". ---
    b_blk = max(1, min(bs, 256 // max(nt, 1)))
    n_blocks = pl.cdiv(bs, b_blk)
    bs_pad = n_blocks * b_blk
    if bs_pad != bs:
        x_im2col = jnp.pad(x_im2col, ((0, bs_pad - bs), (0, 0), (0, 0)))

    kernel = functools.partial(_cnnbasic_kernel, nt=nt, bb=b_blk)

    out_tm = pl.pallas_call(
        kernel,
        out_shape=jax.ShapeDtypeStruct((bs_pad, nt, NS_PAD), jnp.float32),
        grid_spec=pltpu.PrefetchScalarGridSpec(
            num_scalar_prefetch=0,
            grid=(n_blocks,),
            in_specs=[
                pl.BlockSpec((b_blk, nt, K * cin), lambda i: (i, 0, 0)),
                pl.BlockSpec((K * cin, HID), lambda i: (0, 0)),
                pl.BlockSpec((1, HID), lambda i: (0, 0)),
                pl.BlockSpec((HID, K * NS_PAD), lambda i: (0, 0)),
                pl.BlockSpec((1, NS_PAD), lambda i: (0, 0)),
            ],
            out_specs=pl.BlockSpec((b_blk, nt, NS_PAD), lambda i: (i, 0, 0)),
        ),
        compiler_params=pltpu.CompilerParams(
            dimension_semantics=("parallel",),
            vmem_limit_bytes=32 * 1024 * 1024),
    )(x_im2col, w1_flat, b1_2d, w2_cat, b2_p)

    # drop batch padding + output-channel padding, back to PyTorch (bs, Ns, Nt)
    out_tm = out_tm[:bs, :, :ns]
    return jnp.transpose(out_tm, (0, 2, 1))


def _reference_forward(m, c, p, params, *, nc, ns, nt):
    """Pure-JAX reference (lax.conv) for correctness checking."""
    del p
    bs = m.shape[0]
    x = jnp.transpose(c, (0, 1, 3, 2)).reshape(bs, nc * 2, nt)
    dn = ("NCH", "OIH", "NCH")
    y = lax.conv_general_dilated(x, params["w1"], (1,), [(PAD, PAD)],
                                 dimension_numbers=dn)
    y = y + params["b1"][None, :, None]
    y = lax.conv_general_dilated(y, params["w2"], (1,), [(PAD, PAD)],
                                 dimension_numbers=dn)
    y = y + params["b2"][None, :, None]
    return y


if __name__ == "__main__":
    # Small shapes consistent with the module.
    Nc, Ns, Nt = 4, 8, 16
    d_m, d_p = 10, 8
    bs = 2

    key = jax.random.PRNGKey(0)
    k_w1, k_b1, k_w2, k_b2, k_m, k_c, k_p = jax.random.split(key, 7)

    # Deterministic synthetic conv parameters (PyTorch Conv1d weight layout).
    params = {
        "w1": 0.05 * jax.random.normal(k_w1, (HID, Nc * 2, K), jnp.float32),
        "b1": 0.05 * jax.random.normal(k_b1, (HID,), jnp.float32),
        "w2": 0.05 * jax.random.normal(k_w2, (Ns, HID, K), jnp.float32),
        "b2": 0.05 * jax.random.normal(k_b2, (Ns,), jnp.float32),
    }

    # Inputs: m only supplies the batch size; p is unused by forward.
    m = jax.random.normal(k_m, (bs, Nc, Nt, d_m), jnp.float32)
    c = jax.random.normal(k_c, (bs, Nc, Nt, 2), jnp.float32)
    p = jax.random.normal(k_p, (bs, d_p), jnp.float32)

    out = cnnbasic_forward(m, c, p, params, nc=Nc, ns=Ns, nt=Nt)
    out = jax.block_until_ready(out)

    ref = _reference_forward(m, c, p, params, nc=Nc, ns=Ns, nt=Nt)
    assert out.shape == (bs, Ns, Nt), out.shape
    # bf16 MXU inputs with f32 accumulation -> relaxed tolerance vs f32 ref.
    assert jnp.allclose(out, ref, atol=3e-2, rtol=3e-2), \
        float(jnp.max(jnp.abs(out - ref)))

    print("KERNEL_OK")
</pallas_src>

<mosaic_0001>
module attributes {stable_mosaic.version = 11 : i64} {
  func.func @_cnnbasic_kernel(%arg0: i32, %arg1: memref<2x16x40xbf16, #tpu.memory_space<vmem>>, %arg2: memref<40x1024xbf16, #tpu.memory_space<vmem>>, %arg3: memref<1x1024xf32, #tpu.memory_space<vmem>>, %arg4: memref<1024x640xbf16, #tpu.memory_space<vmem>>, %arg5: memref<1x128xf32, #tpu.memory_space<vmem>>, %arg6: memref<2x16x128xf32, #tpu.memory_space<vmem>>) attributes {dimension_semantics = [#tpu.dimension_semantics<parallel>], iteration_bounds = array<i64: 1>, scalar_prefetch = 0 : i64, scratch_operands = 0 : i64, tpu.core_type = #tpu.core_type<tc>, window_params = [{transform_indices = @transform_0, window_bounds = array<i64: 2, 16, 40>}, {pipeline_mode = #tpu.pipeline_mode<synchronous>, transform_indices = @transform_1, window_bounds = array<i64: 40, 1024>}, {pipeline_mode = #tpu.pipeline_mode<synchronous>, transform_indices = @transform_2, window_bounds = array<i64: 1, 1024>}, {pipeline_mode = #tpu.pipeline_mode<synchronous>, transform_indices = @transform_3, window_bounds = array<i64: 1024, 640>}, {pipeline_mode = #tpu.pipeline_mode<synchronous>, transform_indices = @transform_4, window_bounds = array<i64: 1, 128>}, {transform_indices = @transform_5, window_bounds = array<i64: 2, 16, 128>}]} {
    %c0 = arith.constant 0 : index
    %c0_0 = arith.constant 0 : index
    %c0_1 = arith.constant 0 : index
    %0 = vector.load %arg1[%c0, %c0_0, %c0_1] : memref<2x16x40xbf16, #tpu.memory_space<vmem>>, vector<2x16x40xbf16>
    %1 = vector.shape_cast %0 : vector<2x16x40xbf16> to vector<32x40xbf16>
    %c0_2 = arith.constant 0 : index
    %c0_3 = arith.constant 0 : index
    %2 = vector.load %arg2[%c0_2, %c0_3] : memref<40x1024xbf16, #tpu.memory_space<vmem>>, vector<40x1024xbf16>
    %cst = arith.constant dense<0.000000e+00> : vector<32x1024xf32>
    %3 = tpu.matmul %1, %2, %cst {dimension_numbers = #tpu.dot_dimension_numbers<[1], [0], [0], [1], [0, 0, 1, 1], [], []>} : vector<32x40xbf16>, vector<40x1024xbf16>, vector<32x1024xf32> -> vector<32x1024xf32>
    %c0_4 = arith.constant 0 : index
    %c0_5 = arith.constant 0 : index
    %4 = vector.load %arg3[%c0_4, %c0_5] : memref<1x1024xf32, #tpu.memory_space<vmem>>, vector<1x1024xf32>
    %5 = vector.broadcast %4 : vector<1x1024xf32> to vector<32x1024xf32>
    %6 = arith.addf %3, %5 : vector<32x1024xf32>
    %7 = arith.truncf %6 : vector<32x1024xf32> to vector<32x1024xbf16>
    %c0_6 = arith.constant 0 : index
    %c0_7 = arith.constant 0 : index
    %8 = vector.load %arg4[%c0_6, %c0_7] : memref<1024x640xbf16, #tpu.memory_space<vmem>>, vector<1024x640xbf16>
    %cst_8 = arith.constant dense<0.000000e+00> : vector<32x640xf32>
    %9 = tpu.matmul %7, %8, %cst_8 {dimension_numbers = #tpu.dot_dimension_numbers<[1], [0], [0], [1], [0, 0, 1, 1], [], []>} : vector<32x1024xbf16>, vector<1024x640xbf16>, vector<32x640xf32> -> vector<32x640xf32>
    %10 = vector.shape_cast %9 : vector<32x640xf32> to vector<2x16x640xf32>
    %cst_9 = arith.constant 0.000000e+00 : f32
    %11 = vector.broadcast %cst_9 : f32 to vector<2x2x640xf32>
    %12 = tpu.concatenate %11, %10, %11 in 1 : vector<2x2x640xf32>, vector<2x16x640xf32>, vector<2x2x640xf32> -> vector<2x20x640xf32>
    %13 = vector.extract_strided_slice %12 {offsets = [0, 0, 0], sizes = [2, 16, 128], strides = [1, 1, 1]} : vector<2x20x640xf32> to vector<2x16x128xf32>
    %14 = vector.extract_strided_slice %12 {offsets = [0, 1, 128], sizes = [2, 16, 128], strides = [1, 1, 1]} : vector<2x20x640xf32> to vector<2x16x128xf32>
    %15 = arith.addf %13, %14 : vector<2x16x128xf32>
    %16 = vector.extract_strided_slice %12 {offsets = [0, 2, 256], sizes = [2, 16, 128], strides = [1, 1, 1]} : vector<2x20x640xf32> to vector<2x16x128xf32>
    %17 = arith.addf %15, %16 : vector<2x16x128xf32>
    %18 = vector.extract_strided_slice %12 {offsets = [0, 3, 384], sizes = [2, 16, 128], strides = [1, 1, 1]} : vector<2x20x640xf32> to vector<2x16x128xf32>
    %19 = arith.addf %17, %18 : vector<2x16x128xf32>
    %20 = vector.extract_strided_slice %12 {offsets = [0, 4, 512], sizes = [2, 16, 128], strides = [1, 1, 1]} : vector<2x20x640xf32> to vector<2x16x128xf32>
    %21 = arith.addf %19, %20 : vector<2x16x128xf32>
    %c0_10 = arith.constant 0 : index
    %c0_11 = arith.constant 0 : index
    %22 = vector.load %arg5[%c0_10, %c0_11] : memref<1x128xf32, #tpu.memory_space<vmem>>, vector<1x128xf32>
    %23 = vector.shape_cast %22 : vector<1x128xf32> to vector<1x1x128xf32>
    %24 = vector.broadcast %23 : vector<1x1x128xf32> to vector<2x16x128xf32>
    %25 = arith.addf %21, %24 : vector<2x16x128xf32>
    %c0_12 = arith.constant 0 : index
    %c0_13 = arith.constant 0 : index
    %c0_14 = arith.constant 0 : index
    %26 = vector.load %arg6[%c0_12, %c0_13, %c0_14] : memref<2x16x128xf32, #tpu.memory_space<vmem>>, vector<2x16x128xf32>
    tpu.vector_store %arg6[%c0_12, %c0_13, %c0_14], %25 {strides = array<i32>} : memref<2x16x128xf32, #tpu.memory_space<vmem>>, vector<2x16x128xf32>,
    return
  }
  func.func @transform_0(%arg0: i32) -> (i32, i32, i32) {
    %c0_i32 = arith.constant 0 : i32
    %c0_i32_0 = arith.constant 0 : i32
    %c0_i32_1 = arith.constant 0 : i32
    return %arg0, %c0_i32, %c0_i32_0 : i32, i32, i32
  }
  func.func @transform_1(%arg0: i32) -> (i32, i32) {
    %c0_i32 = arith.constant 0 : i32
    %c0_i32_0 = arith.constant 0 : i32
    %c0_i32_1 = arith.constant 0 : i32
    return %c0_i32, %c0_i32_0 : i32, i32
  }
  func.func @transform_2(%arg0: i32) -> (i32, i32) {
    %c0_i32 = arith.constant 0 : i32
    %c0_i32_0 = arith.constant 0 : i32
    %c0_i32_1 = arith.constant 0 : i32
    return %c0_i32, %c0_i32_0 : i32, i32
  }
  func.func @transform_3(%arg0: i32) -> (i32, i32) {
    %c0_i32 = arith.constant 0 : i32
    %c0_i32_0 = arith.constant 0 : i32
    %c0_i32_1 = arith.constant 0 : i32
    return %c0_i32, %c0_i32_0 : i32, i32
  }
  func.func @transform_4(%arg0: i32) -> (i32, i32) {
    %c0_i32 = arith.constant 0 : i32
    %c0_i32_0 = arith.constant 0 : i32
    %c0_i32_1 = arith.constant 0 : i32
    return %c0_i32, %c0_i32_0 : i32, i32
  }
  func.func @transform_5(%arg0: i32) -> (i32, i32, i32) {
    %c0_i32 = arith.constant 0 : i32
    %c0_i32_0 = arith.constant 0 : i32
    %c0_i32_1 = arith.constant 0 : i32
    return %arg0, %c0_i32, %c0_i32_0 : i32, i32, i32
  }
}

</mosaic_0001>

<bundles_post_ra>
// kernel: tpu_custom_call.1
= control target key start
LH: loop header
LB: loop body
LE: loop exit
PB: predicated region body
PF: predicated region fallthrough
CT: control target
= control target key end

     0   :  { %10 = vsyncpa [#allocation3], 0  ;;  %s4857_s0 = inlined_call_operand.hbm [shape: bf16[2,16,40], index: 0, kind: input, shape index: {}]   ;;  %s4858_s1 = inlined_call_operand.hbm [shape: bf16[40,1024], index: 1, kind: input, shape index: {}]   ;;  %s4859_s2 = inlined_call_operand.hbm [shape: f32[1,1024], index: 2, kind: input, shape index: {}]   ;;  %s4860_s3 = inlined_call_operand.hbm [shape: bf16[1024,640], index: 3, kind: input, shape index: {}]   ;;  %s4861_s4 = inlined_call_operand.hbm [shape: f32[1,128], index: 4, kind: input, shape index: {}]   ;;  %s4862_s5 = inlined_call_operand.hbm [shape: f32[2,16,128], index: 5, kind: output, shape index: {}]  }
   0x1   :  { %11 = vsyncpa [#allocation6], 0 }
   0x2   :  { %12 = vsyncpa [#allocation9], 0 }
   0x3   :  { %13 = vsyncpa [#allocation4], 0  ;;  %s4536_s18 = smov [#allocation5]   ;;  %s4396_s22 = scalar_lea.hbm %s4858_s1, 2560 }
   0x4   :  { %s31_s19 = sshll.u32 %s4536_s18, 4  ;;  %p4397_p0 = scmp.ne.s32.totalorder %s4858_s1, %s4396_s22  ;;  %s32_s19 = int_to_ptr.vmem [resolvable:$true] %s31_s19 }
   0x5   :  { %p4400_p1 = scmp.lt.u32.totalorder %s4396_s22, %s4858_s1 }
   0x7   :  { %p4402_p2 = pnand %p4400_p1, %p4397_p0 }
   0x9   :  { %4405 = shalt.err (!%p4402_p2)
}
   0xa   :  { %s4406_s27 = scalar_lea.vmem %s32_s19, 2560  ;;  %p4411_p4 = scmp.lt.s32.totalorder %s32_s19, %s32_s19 }
   0xb   :  { %p4407_p3 = scmp.ne.s32.totalorder %s32_s19, %s4406_s27  ;;  %p4412_p5 = scmp.lt.s32.totalorder %s4406_s27, %s4406_s27 }
   0xd   :  { %p4413_p6 = por %p4412_p5, %p4411_p4 }
   0xf   :  { %p4414_p7 = pnand %p4413_p6, %p4407_p3 }
  0x11   :  { %4417 = shalt.err (!%p4414_p7)
}
  0x12   :  { %s4537_s28 = smov 512   ;;  %s4538_s29 = smov 32  }
  0x13   :  { %37 = dma.hbm_to_vmem [thread:$0]  %s4858_s1, 2560, %s32_s19, [#allocation6], %s4537_s28, %s4537_s28, %s4538_s29  }
  0x14   :  { %s4539_s7 = smov [#allocation8]   ;;  %s4418_s11 = scalar_lea.hbm %s4860_s3, 40960 }
  0x15   :  { %s53_s8 = sshll.u32 %s4539_s7, 4  ;;  %p4419_p8 = scmp.ne.s32.totalorder %s4860_s3, %s4418_s11  ;;  %s54_s8 = int_to_ptr.vmem [resolvable:$true] %s53_s8 }
  0x16   :  { %p4422_p9 = scmp.lt.u32.totalorder %s4418_s11, %s4860_s3 }
  0x18   :  { %p4424_p10 = pnand %p4422_p9, %p4419_p8 }
  0x1a   :  { %4427 = shalt.err (!%p4424_p10)
}
  0x1b   :  { %s4428_s16 = scalar_lea.vmem %s54_s8, 40960  ;;  %p4433_p12 = scmp.lt.s32.totalorder %s54_s8, %s54_s8 }
  0x1c   :  { %p4429_p11 = scmp.ne.s32.totalorder %s54_s8, %s4428_s16  ;;  %p4434_p13 = scmp.lt.s32.totalorder %s4428_s16, %s4428_s16 }
  0x1e   :  { %p4435_p0 = por %p4434_p13, %p4433_p12 }
  0x20   :  { %p4436_p1 = pnand %p4435_p0, %p4429_p11 }
  0x22   :  { %4439 = shalt.err (!%p4436_p1)
}
  0x23   :  { %s4540_s1 = smov 320   ;;  %s4541_s17 = smov 20  }
  0x24   :  { %59 = dma.hbm_to_vmem [thread:$0]  %s4860_s3, 40960, %s54_s8, [#allocation9], %s4540_s1, %s4540_s1, %s4541_s17  }
  0x25   :  { %s4542_s20 = smov [#allocation2]   ;;  %s4440_s24 = scalar_lea.hbm %s4857_s0, 256 }
  0x26   :  { %s19_s21 = sshll.u32 %s4542_s20, 4  ;;  %p4441_p2 = scmp.ne.s32.totalorder %s4857_s0, %s4440_s24  ;;  %s20_s21 = int_to_ptr.vmem [resolvable:$true] %s19_s21 }
  0x27   :  { %p4444_p3 = scmp.lt.u32.totalorder %s4440_s24, %s4857_s0 }
  0x29   :  { %p4446_p4 = pnand %p4444_p3, %p4441_p2 }
  0x2b   :  { %4449 = shalt.err (!%p4446_p4)
}
  0x2c   :  { %s4450_s29 = scalar_lea.vmem %s20_s21, 256  ;;  %p4455_p6 = scmp.lt.s32.totalorder %s20_s21, %s20_s21 }
  0x2d   :  { %p4451_p5 = scmp.ne.s32.totalorder %s20_s21, %s4450_s29  ;;  %p4456_p7 = scmp.lt.s32.totalorder %s4450_s29, %s4450_s29 }
  0x2f   :  { %p4457_p8 = por %p4456_p7, %p4455_p6 }
  0x31   :  { %p4458_p9 = pnand %p4457_p8, %p4451_p5 }
  0x33   :  { %4461 = shalt.err (!%p4458_p9)
}
  0x34   :  { %s4543_s3 = smov 64   ;;  %s4544_s30 = smov 4  }
  0x35   :  { %25 = dma.hbm_to_vmem [thread:$0]  %s4857_s0, 256, %s20_s21, [#allocation3], %s4543_s3, %s4543_s3, %s4544_s30  }
  0x36   :  { %s4545_s8 = smov [#allocation7]   ;;  %s4546_s10 = smov [#allocation10]  }
  0x37   :  { %s44_s9 = sshll.u32 %s4545_s8, 4  ;;  %s66_s11 = sshll.u32 %s4546_s10, 4  ;;  %s45_s9 = int_to_ptr.vmem [resolvable:$true] %s44_s9  ;;  %s67_s11 = int_to_ptr.vmem [resolvable:$true] %s66_s11 }
  0x38   :  { %s4462_s14 = scalar_lea.hbm %s4859_s2, 128 }
  0x39   :  { %p4463_p10 = scmp.ne.s32.totalorder %s4859_s2, %s4462_s14  ;;  %p4466_p11 = scmp.lt.u32.totalorder %s4462_s14, %s4859_s2 }
  0x3b   :  { %p4468_p12 = pnand %p4466_p11, %p4463_p10 }
  0x3d   :  { %4471 = shalt.err (!%p4468_p12)
}
  0x3e   :  { %s4472_s0 = scalar_lea.vmem %s45_s9, 128  ;;  %p4477_p0 = scmp.lt.s32.totalorder %s45_s9, %s45_s9 }
  0x3f   :  { %p4473_p13 = scmp.ne.s32.totalorder %s45_s9, %s4472_s0  ;;  %p4478_p1 = scmp.lt.s32.totalorder %s4472_s0, %s4472_s0 }
  0x41   :  { %p4479_p2 = por %p4478_p1, %p4477_p0 }
  0x43   :  { %p4480_p3 = pnand %p4479_p2, %p4473_p13 }
  0x45   :  { %4483 = shalt.err (!%p4480_p3)
}
  0x46   :  { %47 = dma.hbm_to_vmem [thread:$0]  %s4859_s2, 128, %s45_s9, [#allocation6]  }
  0x47   :  { %s4484_s22 = scalar_lea.hbm %s4861_s4, 16 }
  0x48   :  { %p4485_p4 = scmp.ne.s32.totalorder %s4861_s4, %s4484_s22  ;;  %p4488_p5 = scmp.lt.u32.totalorder %s4484_s22, %s4861_s4 }
  0x4a   :  { %p4490_p6 = pnand %p4488_p5, %p4485_p4 }
  0x4c   :  { %4493 = shalt.err (!%p4490_p6)
}
  0x4d   :  { %s4494_s27 = scalar_lea.vmem %s67_s11, 16  ;;  %s4498_s28 = scalar_lea.vmem %s67_s11, 32 }
  0x4e   :  { %p4495_p7 = scmp.ne.s32.totalorder %s67_s11, %s4494_s27  ;;  %p4499_p8 = scmp.lt.s32.totalorder %s67_s11, %s67_s11 }
  0x4f   :  { %p4500_p9 = scmp.lt.s32.totalorder %s4498_s28, %s4494_s27 }
  0x51   :  { %p4501_p10 = por %p4500_p9, %p4499_p8 }
  0x53   :  { %p4502_p11 = pnand %p4501_p10, %p4495_p7 }
  0x55   :  { %4505 = shalt.err (!%p4502_p11)
}
  0x56   :  { %69 = dma.hbm_to_vmem [thread:$0]  %s4861_s4, 16, %s67_s11, [#allocation9]  }
  0x57   :  { %4528 = dma.done.wait [#allocation3], 256  }
  0x58   :  { %4529 = vsyncadd [#allocation3], 4294967040 }
  0x59   :  { %4530 = dma.done.wait [#allocation6], 2688  }
  0x5a   :  { %4531 = vsyncadd [#allocation6], 4294964608 }
  0x5b   :  { %4532 = dma.done.wait [#allocation9], 40976  }
  0x5c   :  { %4533 = vsyncadd [#allocation9], 4294926320  ;;  %v4547_v0 = vmov 0   ;;  %v90_v1 = vld [vmem:[#allocation5] sm:$0xff]  ;;  %v91_v9 = vld [vmem:[#allocation5 + $0x8] sm:$0xff]  ;;  %vm269_vm0 = vcmask 1043456  }
  0x5d   :  { %326 = vmatprep.mubr.bf16.mxu0 %v4547_v0  ;;  %379 = vmatprep.mubr.bf16.mxu1 %v4547_v0  ;;  %v94_v2 = vld [vmem:[#allocation5 + $0x20] sm:$0xff]  ;;  %v95_v10 = vld [vmem:[#allocation5 + $0x28] sm:$0xff]  ;;  %v92_v20 = vld [vmem:[#allocation5 + $0x10] sm:$0xff]  ;;  %vm262_vm1 = vcmask 326656   ;;  %vm3210_vm2 = vcmask 1041408   ;;  %vm3306_vm3 = vcmask 1045504  }
  0x5e   :  { %v98_v3 = vld [vmem:[#allocation5 + $0x40] sm:$0xff]  ;;  %v3407_v4 = vcombine.high %v90_v1, %v94_v2  ;;  %v3406_v5 = vcombine.low %v90_v1, %v94_v2  ;;  %v3409_v12 = vcombine.high %v91_v9, %v95_v10  ;;  %v3408_v13 = vcombine.low %v91_v9, %v95_v10  ;;  %v99_v14 = vld [vmem:[#allocation5 + $0x48] sm:$0xff]  ;;  %v96_v21 = vld [vmem:[#allocation5 + $0x30] sm:$0xff]  ;;  %s4548_s4 = smov [#allocation11]  }
  0x5f   :  { %v102_v6 = vld [vmem:[#allocation5 + $0x60] sm:$0xff]  ;;  %v103_v15 = vld [vmem:[#allocation5 + $0x68] sm:$0xff]  ;;  %v100_v25 = vld [vmem:[#allocation5 + $0x50] sm:$0xff]  ;;  %v3411_v27 = vcombine.high %v92_v20, %v96_v21  ;;  %v3410_v33 = vcombine.low %v92_v20, %v96_v21  ;;  %vm3283_vm4 = vcmask 1046528   ;;  %vm3329_vm5 = vcmask 1044480   ;;  %s3390_s3 = sshll.u32 %s4548_s4, 4  ;;  %s3391_s3 = int_to_ptr.vmem [resolvable:$true] %s3390_s3 }
  0x60   :  { %v3415_v7 = vcombine.high %v98_v3, %v102_v6  ;;  %v106_v8 = vld [vmem:[#allocation5 + $0x80] sm:$0xff]  ;;  %294 = vmatprep.subr.bf16.mxu0 %v3407_v4  ;;  %v3414_v11 = vcombine.low %v98_v3, %v102_v6  ;;  %v3417_v18 = vcombine.high %v99_v14, %v103_v15  ;;  %v107_v19 = vld [vmem:[#allocation5 + $0x88] sm:$0xff]  ;;  %347 = vmatprep.subr.bf16.mxu1 %v3409_v12  ;;  %v104_v28 = vld [vmem:[#allocation5 + $0x70] sm:$0xff]  ;;  %s4506_s30 = scalar_lea.vmem %s3391_s3, 512  ;;  %p4511_p13 = scmp.lt.s32.totalorder %s3391_s3, %s3391_s3 }
  0x61   :  { %295 = vmatpush1.bf16.msra.mxu0 %v3406_v5  ;;  %v3423_v16 = vcombine.high %v106_v8, %v106_v8  ;;  %v3422_v17 = vcombine.low %v106_v8, %v106_v8  ;;  %348 = vmatpush1.bf16.msra.mxu1 %v3408_v13  ;;  %v3416_v22 = vcombine.low %v99_v14, %v103_v15  ;;  %v93_v29 = vld [vmem:[#allocation5 + $0x18] sm:$0xff]  ;;  %v3940_v31 = vld [vmem:[#allocation2] sm:$0xff]   ;;  %v3950_v50 = vld [vmem:[#allocation8 + $0x4] ss:$20 sps:$4 sm:$0xff]   ;;  %p4507_p12 = scmp.ne.s32.totalorder %s3391_s3, %s4506_s30  ;;  %p4512_p0 = scmp.lt.s32.totalorder %s4506_s30, %s4506_s30 }
  0x62   :  { %296 = vmatprep.subr.bf16.mxu0 %v3415_v7  ;;  %349 = vmatprep.subr.bf16.mxu1 %v3417_v18  ;;  %v3425_v23 = vcombine.high %v107_v19, %v107_v19  ;;  %v3424_v24 = vcombine.low %v107_v19, %v107_v19  ;;  %v97_v30 = vld [vmem:[#allocation5 + $0x38] sm:$0xff]  ;;  %v3419_v34 = vcombine.high %v100_v25, %v104_v28  ;;  %v108_v38 = vld [vmem:[#allocation5 + $0x90] sm:$0xff]  ;;  %v3971_v2 = vld [vmem:[#allocation8 + $0x84] ss:$20 sps:$4 sm:$0xff]  }
  0x63   :  { %v271_v26 = vsel %vm269_vm0, %v3422_v17, 0  ;;  %v3413_v35 = vcombine.high %v93_v29, %v97_v30  ;;  %v101_v36 = vld [vmem:[#allocation5 + $0x58] sm:$0xff]  ;;  %v3412_v39 = vcombine.low %v93_v29, %v97_v30  ;;  %v3418_v40 = vcombine.low %v100_v25, %v104_v28  ;;  %v3953_v52 = vld [vmem:[#allocation8 + $0xc] ss:$20 sps:$4 sm:$0xff]   ;;  %v3951_v55 = vld [vmem:[#allocation8 + $0x8] ss:$20 sps:$4 sm:$0xff]   ;;  %p4513_p1 = por %p4512_p0, %p4511_p13 }
  0x64   :  { %v277_v32 = vsel %vm269_vm0, %v3424_v24, 0  ;;  %v105_v37 = vld [vmem:[#allocation5 + $0x78] sm:$0xff]  ;;  %v3427_v42 = vcombine.high %v108_v38, %v108_v38  ;;  %v3426_v43 = vcombine.low %v108_v38, %v108_v38  ;;  %v3956_v54 = vld [vmem:[#allocation8 + $0x2c] ss:$20 sps:$4 sm:$0xff]   ;;  %v3954_v56 = vld [vmem:[#allocation8 + $0x28] ss:$20 sps:$4 sm:$0xff]  }
  0x65   :  { %297 = vmatpush1.bf16.msra.mxu0 %v3414_v11  ;;  %350 = vmatpush1.bf16.msra.mxu1 %v3416_v22  ;;  %v3421_v41 = vcombine.high %v101_v36, %v105_v37  ;;  %v109_v44 = vld [vmem:[#allocation5 + $0x98] sm:$0xff]  ;;  %v3420_v46 = vcombine.low %v101_v36, %v105_v37  ;;  %v3963_v63 = vld [vmem:[#allocation8 + $0x58] ss:$20 sps:$4 sm:$0xff]   ;;  %v3975_v6 = vld [vmem:[#allocation8 + $0xa8] ss:$20 sps:$4 sm:$0xff]   ;;  %p4514_p2 = pnand %p4513_p1, %p4507_p12 }
  0x66   :  { %3430 = vmatprep.subr.msk.bf16.mxu0 %vm269_vm0, %v3423_v16  ;;  %3433 = vmatprep.subr.msk.bf16.mxu1 %vm269_vm0, %v3425_v23  ;;  %v3941_v45 = vld [vmem:[#allocation2 + $0x8] sm:$0xff]   ;;  %v3428_v47 = vcombine.low %v109_v44, %v109_v44  ;;  %v283_v48 = vsel %vm269_vm0, %v3426_v43, 0  ;;  %v3429_v49 = vcombine.high %v109_v44, %v109_v44  ;;  %v3966_v1 = vld [vmem:[#allocation8 + $0x78] ss:$20 sps:$4 sm:$0xff]   ;;  %v3978_v8 = vld [vmem:[#allocation8 + $0xc8] ss:$20 sps:$4 sm:$0xff]  }
  0x67   :  { %v3948_v53 = vld [vmem:[#allocation8] ss:$20 sps:$4 sm:$0xff]   ;;  %v3957_v59 = vld [vmem:[#allocation8 + $0x30] ss:$20 sps:$4 sm:$0xff]   ;;  %v3987_v15 = vld [vmem:[#allocation8 + $0xf8] ss:$20 sps:$4 sm:$0xff]  }
  0x68   :  { %v289_v51 = vsel %vm269_vm0, %v3428_v47, 0  ;;  %v3959_v57 = vld [vmem:[#allocation8 + $0x34] ss:$20 sps:$4 sm:$0xff]   ;;  %v3960_v60 = vld [vmem:[#allocation8 + $0x50] ss:$20 sps:$4 sm:$0xff]  }
  0x69   :  { %299 = vmatpush1.bf16.msra.mxu0 %v271_v26  ;;  %352 = vmatpush1.bf16.msra.mxu1 %v277_v32  ;;  %v3962_v58 = vld [vmem:[#allocation8 + $0x54] ss:$20 sps:$4 sm:$0xff]   ;;  %v3965_v61 = vld [vmem:[#allocation8 + $0x5c] ss:$20 sps:$4 sm:$0xff]   ;;  %v3974_v3 = vld [vmem:[#allocation8 + $0xa4] ss:$20 sps:$4 sm:$0xff]  }
  0x6a   :  { %400 = vmatprep.subr.bf16.mxu0 %v3411_v27  ;;  %453 = vmatprep.subr.bf16.mxu1 %v3413_v35  ;;  %v3968_v62 = vld [vmem:[#allocation8 + $0x7c] ss:$20 sps:$4 sm:$0xff]   ;;  %v3972_v4 = vld [vmem:[#allocation8 + $0xa0] ss:$20 sps:$4 sm:$0xff]   ;;  %v3990_v16 = vld [vmem:[#allocation8 + $0x118] ss:$20 sps:$4 sm:$0xff]  }
  0x6b   :  { %v3977_v5 = vld [vmem:[#allocation8 + $0xac] ss:$20 sps:$4 sm:$0xff]   ;;  %v3983_v9 = vld [vmem:[#allocation8 + $0xd4] ss:$20 sps:$4 sm:$0xff]   ;;  %v3981_v11 = vld [vmem:[#allocation8 + $0xd0] ss:$20 sps:$4 sm:$0xff]  }
  0x6c   :  { %3431 = vmatmul.mubr.msk.bf16.vlgmr.msra.gmra.mrb[0].mxu0 %vm262_vm1, %v3940_v31  ;;  %3434 = vmatmul.mubr.msk.bf16.vlgmr.msra.gmra.mrb[0].mxu1 %vm262_vm1, %v3940_v31  ;;  %v3980_v7 = vld [vmem:[#allocation8 + $0xcc] ss:$20 sps:$4 sm:$0xff]   ;;  %v3986_v10 = vld [vmem:[#allocation8 + $0xf4] ss:$20 sps:$4 sm:$0xff]   ;;  %v3984_v12 = vld [vmem:[#allocation8 + $0xf0] ss:$20 sps:$4 sm:$0xff]  }
  0x6d   :  { %336 = vmatprep.mubr.bf16.mxu0 %v4547_v0  ;;  %401 = vmatpush1.bf16.msra.mxu0 %v3410_v33  ;;  %v3989_v13 = vld [vmem:[#allocation8 + $0xfc] ss:$20 sps:$4 sm:$0xff]   ;;  %v3995_v17 = vld [vmem:[#allocation8 + $0x124] ss:$20 sps:$4 sm:$0xff]   ;;  %v3993_v19 = vld [vmem:[#allocation8 + $0x120] ss:$20 sps:$4 sm:$0xff]  }
  0x6e   :  { %402 = vmatprep.subr.bf16.mxu0 %v3419_v34  ;;  %389 = vmatprep.mubr.bf16.mxu1 %v4547_v0  ;;  %v3992_v14 = vld [vmem:[#allocation8 + $0x11c] ss:$20 sps:$4 sm:$0xff]   ;;  %v3998_v18 = vld [vmem:[#allocation8 + $0x144] ss:$20 sps:$4 sm:$0xff]   ;;  %v3996_v20 = vld [vmem:[#allocation8 + $0x140] ss:$20 sps:$4 sm:$0xff]  }
  0x6f   :  { %454 = vmatpush1.bf16.msra.mxu1 %v3412_v39  ;;  %v4001_v21 = vld [vmem:[#allocation8 + $0x14c] ss:$20 sps:$4 sm:$0xff]   ;;  %v3999_v23 = vld [vmem:[#allocation8 + $0x148] ss:$20 sps:$4 sm:$0xff]   ;;  %v4005_v27 = vld [vmem:[#allocation8 + $0x170] ss:$20 sps:$4 sm:$0xff]  }
  0x70   :  { %455 = vmatprep.subr.bf16.mxu1 %v3421_v41  ;;  %v4004_v22 = vld [vmem:[#allocation8 + $0x16c] ss:$20 sps:$4 sm:$0xff]   ;;  %v4002_v24 = vld [vmem:[#allocation8 + $0x168] ss:$20 sps:$4 sm:$0xff]   ;;  %v4008_v28 = vld [vmem:[#allocation8 + $0x190] ss:$20 sps:$4 sm:$0xff]  }
  0x71   :  { %403 = vmatpush1.bf16.msra.mxu0 %v3418_v40  ;;  %v4007_v25 = vld [vmem:[#allocation8 + $0x174] ss:$20 sps:$4 sm:$0xff]   ;;  %v4013_v29 = vld [vmem:[#allocation8 + $0x19c] ss:$20 sps:$4 sm:$0xff]   ;;  %v4014_v32 = vld [vmem:[#allocation8 + $0x1b8] ss:$20 sps:$4 sm:$0xff]  }
  0x72   :  { %3436 = vmatprep.subr.msk.bf16.mxu0 %vm269_vm0, %v3427_v42  ;;  %v4010_v26 = vld [vmem:[#allocation8 + $0x194] ss:$20 sps:$4 sm:$0xff]   ;;  %v4016_v30 = vld [vmem:[#allocation8 + $0x1bc] ss:$20 sps:$4 sm:$0xff]   ;;  %v4019_v33 = vld [vmem:[#allocation8 + $0x1c4] ss:$20 sps:$4 sm:$0xff]  }
  0x73   :  { %456 = vmatpush1.bf16.msra.mxu1 %v3420_v46  ;;  %v4022_v34 = vld [vmem:[#allocation8 + $0x1e4] ss:$20 sps:$4 sm:$0xff]   ;;  %v4017_v35 = vld [vmem:[#allocation8 + $0x1c0] ss:$20 sps:$4 sm:$0xff]   ;;  %v4023_v39 = vld [vmem:[#allocation8 + $0x1e8] ss:$20 sps:$4 sm:$0xff]  }
  0x74   :  { %3432 = vmatmul.mubr.msk.bf16.gmra.mrb[4].mxu0 %vm262_vm1, %v3941_v45  ;;  %3439 = vmatprep.subr.msk.bf16.mxu1 %vm269_vm0, %v3429_v49  ;;  %v4020_v36 = vld [vmem:[#allocation8 + $0x1e0] ss:$20 sps:$4 sm:$0xff]   ;;  %v4026_v40 = vld [vmem:[#allocation8 + $0x208] ss:$20 sps:$4 sm:$0xff]   ;;  %v4029_v42 = vld [vmem:[#allocation8 + $0x210] ss:$20 sps:$4 sm:$0xff]  }
  0x75   :  { %405 = vmatpush1.bf16.msra.mxu0 %v283_v48  ;;  %432 = vmatprep.mubr.bf16.mxu0 %v4547_v0  ;;  %v4025_v37 = vld [vmem:[#allocation8 + $0x1ec] ss:$20 sps:$4 sm:$0xff]   ;;  %v4031_v41 = vld [vmem:[#allocation8 + $0x214] ss:$20 sps:$4 sm:$0xff]   ;;  %v4037_v44 = vld [vmem:[#allocation8 + $0x23c] ss:$20 sps:$4 sm:$0xff]  }
  0x76   :  { %2570 = vmatprep.subr.bf16.mxu0 %v3950_v50  ;;  %3435 = vmatmul.mubr.msk.bf16.gmra.mrb[4].mxu1 %vm262_vm1, %v3941_v45  ;;  %v4028_v38 = vld [vmem:[#allocation8 + $0x20c] ss:$20 sps:$4 sm:$0xff]   ;;  %v4034_v43 = vld [vmem:[#allocation8 + $0x234] ss:$20 sps:$4 sm:$0xff]   ;;  %v4040_v47 = vld [vmem:[#allocation8 + $0x25c] ss:$20 sps:$4 sm:$0xff]  }
  0x77   :  { %458 = vmatpush1.bf16.msra.mxu1 %v289_v51  ;;  %485 = vmatprep.mubr.bf16.mxu1 %v4547_v0  ;;  %v4035_v46 = vld [vmem:[#allocation8 + $0x238] ss:$20 sps:$4 sm:$0xff]   ;;  %v4041_v50 = vld [vmem:[#allocation8 + $0x260] ss:$20 sps:$4 sm:$0xff]  }
  0x78   :  { %2782 = vmatprep.subr.bf16.mxu1 %v3953_v52  ;;  %v4043_v48 = vld [vmem:[#allocation8 + $0x264] ss:$20 sps:$4 sm:$0xff]   ;;  %v4049_v52 = vld [vmem:[#allocation8 + $0x28c] ss:$20 sps:$4 sm:$0xff]  }
  0x79   :  { %v4038_v49 = vld [vmem:[#allocation8 + $0x258] ss:$20 sps:$4 sm:$0xff]  }
  0x7a   :  { %v4046_v51 = vld [vmem:[#allocation8 + $0x284] ss:$20 sps:$4 sm:$0xff]  }
  0x7c   :  { %3437 = vmatmul.mubr.msk.bf16.vlgmr.msra.gmra.mrb[8].mxu0 %vm262_vm1, %v3940_v31 }
  0x7d   :  { %442 = vmatprep.mubr.bf16.mxu0 %v4547_v0  ;;  %2571 = vmatpush1.bf16.msra.mxu0 %v3948_v53  ;;  %v112_v53 = vlaneseq }
  0x7e   :  { %2572 = vmatprep.subr.bf16.mxu0 %v3956_v54  ;;  %3440 = vmatmul.mubr.msk.bf16.vlgmr.msra.gmra.mrb[8].mxu1 %vm262_vm1, %v3940_v31  ;;  %v4011_v31 = vld [vmem:[#allocation8 + $0x198] ss:$20 sps:$4 sm:$0xff]  }
  0x7f   :  { %2783 = vmatpush1.bf16.msra.mxu1 %v3951_v55  ;;  %495 = vmatprep.mubr.bf16.mxu1 %v4547_v0  ;;  %v3969_v0 = vld [vmem:[#allocation8 + $0x80] ss:$20 sps:$4 sm:$0xff]   ;;  %v4665_v54 = vshrl.u32 %v112_v53, 7 }
  0x80   :  { %2784 = vmatprep.subr.bf16.mxu1 %v3959_v57 }
  0x81   :  { %2573 = vmatpush1.bf16.msra.mxu0 %v3954_v56  ;;  %v114_v55 = vsub.s32 0, %v4665_v54  ;;  %v4668_v56 = vld [vmem:[#allocation7] sm:$0xff]  ;;  %v118_v57 = vsub.s32 1, %v4665_v54 }
  0x82   :  { %2574 = vmatprep.subr.bf16.mxu0 %v3962_v58  ;;  %v122_v58 = vsub.s32 2, %v4665_v54 }
  0x83   :  { %2785 = vmatpush1.bf16.msra.mxu1 %v3957_v59  ;;  %v126_v59 = vsub.s32 3, %v4665_v54 }
  0x84   :  { %3438 = vmatmul.mubr.msk.bf16.gmra.mrb[12].mxu0 %vm262_vm1, %v3941_v45  ;;  %2786 = vmatprep.subr.bf16.mxu1 %v3965_v61 }
  0x85   :  { %2575 = vmatpush1.bf16.msra.mxu0 %v3960_v60  ;;  %v115_v60 = vrot.slane %v4668_v56, %v114_v55 }
  0x86   :  { %2576 = vmatprep.subr.bf16.mxu0 %v3968_v62  ;;  %3441 = vmatmul.mubr.msk.bf16.gmra.mrb[12].mxu1 %vm262_vm1, %v3941_v45  ;;  %v4032_v45 = vld [vmem:[#allocation8 + $0x230] ss:$20 sps:$4 sm:$0xff]   ;;  %v119_v62 = vrot.slane %v4668_v56, %v118_v57 }
  0x87   :  { %2787 = vmatpush1.bf16.msra.mxu1 %v3963_v63  ;;  %v123_v63 = vrot.slane %v4668_v56, %v122_v58 }
  0x88   :  { %2788 = vmatprep.subr.bf16.mxu1 %v3971_v2  ;;  %v4677_v2 = vrot.slane %v4668_v56, %v126_v59 }
  0x89   :  { %2577 = vmatpush1.bf16.msra.mxu0 %v3966_v1 }
  0x8a   :  { %2578 = vmatprep.subr.bf16.mxu0 %v3974_v3 }
  0x8b   :  { %2789 = vmatpush1.bf16.msra.mxu1 %v3969_v0 }
  0x8c   :  { %2790 = vmatprep.subr.bf16.mxu1 %v3977_v5 }
  0x8d   :  { %2579 = vmatpush1.bf16.msra.mxu0 %v3972_v4 }
  0x8e   :  { %2580 = vmatprep.subr.bf16.mxu0 %v3980_v7 }
  0x8f   :  { %2791 = vmatpush1.bf16.msra.mxu1 %v3975_v6 }
  0x90   :  { %2792 = vmatprep.subr.bf16.mxu1 %v3983_v9 }
  0x91   :  { %2581 = vmatpush1.bf16.msra.mxu0 %v3978_v8 }
  0x92   :  { %2582 = vmatprep.subr.bf16.mxu0 %v3986_v10 }
  0x93   :  { %2793 = vmatpush1.bf16.msra.mxu1 %v3981_v11 }
  0x94   :  { %2794 = vmatprep.subr.bf16.mxu1 %v3989_v13 }
  0x95   :  { %2583 = vmatpush1.bf16.msra.mxu0 %v3984_v12 }
  0x96   :  { %2584 = vmatprep.subr.bf16.mxu0 %v3992_v14 }
  0x97   :  { %2795 = vmatpush1.bf16.msra.mxu1 %v3987_v15  ;;  %v4044_v15 = vld [vmem:[#allocation8 + $0x280] ss:$20 sps:$4 sm:$0xff]  }
  0x98   :  { %2796 = vmatprep.subr.bf16.mxu1 %v3995_v17 }
  0x99   :  { %2585 = vmatpush1.bf16.msra.mxu0 %v3990_v16  ;;  %v4047_v16 = vld [vmem:[#allocation8 + $0x288] ss:$20 sps:$4 sm:$0xff]  }
  0x9a   :  { %2586 = vmatprep.subr.bf16.mxu0 %v3998_v18 }
  0x9b   :  { %2797 = vmatpush1.bf16.msra.mxu1 %v3993_v19  ;;  %v4052_v19 = vld [vmem:[#allocation8 + $0x2ac] ss:$20 sps:$4 sm:$0xff]  }
  0x9c   :  { %2798 = vmatprep.subr.bf16.mxu1 %v4001_v21 }
  0x9d   :  { %2587 = vmatpush1.bf16.msra.mxu0 %v3996_v20  ;;  %v4055_v20 = vld [vmem:[#allocation8 + $0x2b4] ss:$20 sps:$4 sm:$0xff]  }
  0x9e   :  { %2588 = vmatprep.subr.bf16.mxu0 %v4004_v22 }
  0x9f   :  { %2799 = vmatpush1.bf16.msra.mxu1 %v3999_v23 }
  0xa0   :  { %2800 = vmatprep.subr.bf16.mxu1 %v4007_v25 }
  0xa1   :  { %2589 = vmatpush1.bf16.msra.mxu0 %v4002_v24 }
  0xa2   :  { %2590 = vmatprep.subr.bf16.mxu0 %v4010_v26 }
  0xa3   :  { %2801 = vmatpush1.bf16.msra.mxu1 %v4005_v27  ;;  %v130_v27 = vsub.s32 4, %v4665_v54 }
  0xa4   :  { %2802 = vmatprep.subr.bf16.mxu1 %v4013_v29  ;;  %v4053_v29 = vld [vmem:[#allocation8 + $0x2b0] ss:$20 sps:$4 sm:$0xff]  }
  0xa5   :  { %2591 = vmatpush1.bf16.msra.mxu0 %v4008_v28  ;;  %v4050_v28 = vld [vmem:[#allocation8 + $0x2a8] ss:$20 sps:$4 sm:$0xff]  }
  0xa6   :  { %2592 = vmatprep.subr.bf16.mxu0 %v4016_v30 }
  0xa7   :  { %2803 = vmatpush1.bf16.msra.mxu1 %v4011_v31 }
  0xa8   :  { %2804 = vmatprep.subr.bf16.mxu1 %v4019_v33  ;;  %v4058_v33 = vld [vmem:[#allocation8 + $0x2d4] ss:$20 sps:$4 sm:$0xff]  }
  0xa9   :  { %2593 = vmatpush1.bf16.msra.mxu0 %v4014_v32  ;;  %v134_v32 = vsub.s32 5, %v4665_v54 }
  0xaa   :  { %2594 = vmatprep.subr.bf16.mxu0 %v4022_v34  ;;  %v4061_v34 = vld [vmem:[#allocation8 + $0x2dc] ss:$20 sps:$4 sm:$0xff]  }
  0xab   :  { %2805 = vmatpush1.bf16.msra.mxu1 %v4017_v35 }
  0xac   :  { %2806 = vmatprep.subr.bf16.mxu1 %v4025_v37 }
  0xad   :  { %2595 = vmatpush1.bf16.msra.mxu0 %v4020_v36 }
  0xae   :  { %2596 = vmatprep.subr.bf16.mxu0 %v4028_v38 }
  0xaf   :  { %2807 = vmatpush1.bf16.msra.mxu1 %v4023_v39 }
  0xb0   :  { %2808 = vmatprep.subr.bf16.mxu1 %v4031_v41 }
  0xb1   :  { %2597 = vmatpush1.bf16.msra.mxu0 %v4026_v40 }
  0xb2   :  { %2598 = vmatprep.subr.bf16.mxu0 %v4034_v43 }
  0xb3   :  { %2809 = vmatpush1.bf16.msra.mxu1 %v4029_v42 }
  0xb4   :  { %2810 = vmatprep.subr.bf16.mxu1 %v4037_v44  ;;  %v4699_v44 = vrot.slane %v4668_v56, %v130_v27 }
  0xb5   :  { %2599 = vmatpush1.bf16.msra.mxu0 %v4032_v45  ;;  %v4056_v45 = vld [vmem:[#allocation8 + $0x2d0] ss:$20 sps:$4 sm:$0xff]  }
  0xb6   :  { %2600 = vmatprep.subr.bf16.mxu0 %v4040_v47 }
  0xb7   :  { %2811 = vmatpush1.bf16.msra.mxu1 %v4035_v46  ;;  %v4059_v46 = vld [vmem:[#allocation8 + $0x2d8] ss:$20 sps:$4 sm:$0xff]  }
  0xb8   :  { %2812 = vmatprep.subr.bf16.mxu1 %v4043_v48 }
  0xb9   :  { %2601 = vmatpush1.bf16.msra.mxu0 %v4038_v49 }
  0xba   :  { %2623 = vmatprep.subr.bf16.mxu0 %v4046_v51  ;;  %v4064_v51 = vld [vmem:[#allocation8 + $0x2fc] ss:$20 sps:$4 sm:$0xff]  }
  0xbb   :  { %2813 = vmatpush1.bf16.msra.mxu1 %v4041_v50  ;;  %v135_v50 = vrot.slane %v4668_v56, %v134_v32 }
  0xbc   :  { %2835 = vmatprep.subr.bf16.mxu1 %v4049_v52  ;;  %v4067_v52 = vld [vmem:[#allocation8 + $0x304] ss:$20 sps:$4 sm:$0xff]  }
 0x13f   :  { %v328_v61 = vpop.f32.mrb[0].mxu0  ;;  %v381_v6 = vpop.f32.mrb[0].mxu1 }
 0x140   :  { %v330_v1 = vpop.f32.mrb[1].mxu0  ;;  %v329_v0 = vadd.f32 %v328_v61, %v115_v60  ;;  %v382_v9 = vadd.f32 %v381_v6, %v123_v63  ;;  %v383_v10 = vpop.f32.mrb[1].mxu1  ;;  %v4062_v61 = vld [vmem:[#allocation8 + $0x2f8] ss:$20 sps:$4 sm:$0xff]  }
 0x141   :  { %v332_v3 = vpop.f32.mrb[2].mxu0  ;;  %v331_v7 = vadd.f32 %v330_v1, %v119_v62  ;;  %v384_v12 = vadd.f32 %v383_v10, %v4677_v2  ;;  %v385_v13 = vpop.f32.mrb[2].mxu1  ;;  %v4076_v10 = vld [vmem:[#allocation8 + $0x34c] ss:$20 sps:$4 sm:$0xff]  }
 0x142   :  { %v333_v4 = vadd.f32 %v332_v3, %v115_v60  ;;  %v334_v5 = vpop.f32.mrb[3].mxu0  ;;  %v386_v17 = vadd.f32 %v385_v13, %v123_v63  ;;  %v387_v18 = vpop.f32.mrb[3].mxu1  ;;  %v4073_v3 = vld [vmem:[#allocation8 + $0x32c] ss:$20 sps:$4 sm:$0xff]  }
 0x143   :  { %v335_v8 = vadd.f32 %v334_v5, %v119_v62  ;;  %v388_v21 = vadd.f32 %v387_v18, %v4677_v2 }
 0x144   :  { %v4679_v11 = vpack.c.bf16 %v333_v4, %v329_v0  ;;  %v4687_v23 = vpack.c.bf16 %v386_v17, %v382_v9 }
 0x145   :  { %v4682_v14 = vpack.c.bf16 %v335_v8, %v331_v7  ;;  %v4691_v26 = vpack.c.bf16 %v388_v21, %v384_v12  ;;  %v4068_v7 = vld [vmem:[#allocation8 + $0x320] ss:$20 sps:$4 sm:$0xff]   ;;  %v4071_v8 = vld [vmem:[#allocation8 + $0x328] ss:$20 sps:$4 sm:$0xff]   ;;  %v142_v21 = vsub.s32 7, %v4665_v54 }
 0x146   :  { %v4079_v12 = vld [vmem:[#allocation8 + $0x354] ss:$20 sps:$4 sm:$0xff]  }
 0x147   :  { %2602 = vmatprep.mubr.bf16.mxu0 %v4682_v14  ;;  %2814 = vmatprep.mubr.bf16.mxu1 %v4682_v14  ;;  %v338_v22 = vpop.f32.mrb[4].mxu0  ;;  %v4729_v32 = vrot.slane %v4668_v56, %v142_v21  ;;  %v4131_v21 = vld [vmem:[#allocation8 + $0x4b8] ss:$20 sps:$4 sm:$0xff]  }
 0x148   :  { %2603 = vmatmul.mubr.bf16.vlgmr.msra.gmra.mrb[16].mxu0 %v4679_v11  ;;  %2815 = vmatmul.mubr.bf16.vlgmr.msra.gmra.mrb[16].mxu1 %v4679_v11  ;;  %v339_v24 = vadd.f32 %v338_v22, %v115_v60  ;;  %v340_v25 = vpop.f32.mrb[5].mxu0  ;;  %v4082_v22 = vld [vmem:[#allocation8 + $0x374] ss:$20 sps:$4 sm:$0xff]  }
 0x149   :  { %2624 = vmatpush1.bf16.msra.mxu0 %v4044_v15  ;;  %2836 = vmatpush1.bf16.msra.mxu1 %v4047_v16  ;;  %v341_v30 = vadd.f32 %v340_v25, %v119_v62  ;;  %v342_v31 = vpop.f32.mrb[6].mxu0  ;;  %v391_v37 = vpop.f32.mrb[4].mxu1  ;;  %v4074_v15 = vld [vmem:[#allocation8 + $0x348] ss:$20 sps:$4 sm:$0xff]   ;;  %v4077_v16 = vld [vmem:[#allocation8 + $0x350] ss:$20 sps:$4 sm:$0xff]  }
 0x14a   :  { %2625 = vmatprep.subr.bf16.mxu0 %v4052_v19  ;;  %2837 = vmatprep.subr.bf16.mxu1 %v4055_v20  ;;  %v343_v35 = vadd.f32 %v342_v31, %v115_v60  ;;  %v344_v36 = vpop.f32.mrb[7].mxu0  ;;  %v392_v39 = vadd.f32 %v391_v37, %v123_v63  ;;  %v393_v40 = vpop.f32.mrb[5].mxu1  ;;  %v138_v19 = vsub.s32 6, %v4665_v54  ;;  %v4080_v54 = vld [vmem:[#allocation8 + $0x370] ss:$20 sps:$4 sm:$0xff]  }
 0x14b   :  { %v345_v38 = vadd.f32 %v344_v36, %v119_v62  ;;  %v394_v42 = vadd.f32 %v393_v40, %v4677_v2  ;;  %v395_v43 = vpop.f32.mrb[6].mxu1  ;;  %v4065_v62 = vld [vmem:[#allocation8 + $0x300] ss:$20 sps:$4 sm:$0xff]   ;;  %v4088_v40 = vld [vmem:[#allocation8 + $0x39c] ss:$20 sps:$4 sm:$0xff]  }
 0x14c   :  { %v4695_v41 = vpack.c.bf16 %v343_v35, %v339_v24  ;;  %v396_v48 = vadd.f32 %v395_v43, %v123_v63  ;;  %v397_v49 = vpop.f32.mrb[7].mxu1  ;;  %v4085_v24 = vld [vmem:[#allocation8 + $0x37c] ss:$20 sps:$4 sm:$0xff]   ;;  %v4083_v35 = vld [vmem:[#allocation8 + $0x378] ss:$20 sps:$4 sm:$0xff]  }
 0x14d   :  { %2626 = vmatpush1.bf16.msra.mxu0 %v4050_v28  ;;  %2838 = vmatpush1.bf16.msra.mxu1 %v4053_v29  ;;  %v4701_v47 = vpack.c.bf16 %v345_v38, %v341_v30  ;;  %v398_v53 = vadd.f32 %v397_v49, %v4677_v2  ;;  %v4070_v2 = vld [vmem:[#allocation8 + $0x324] ss:$20 sps:$4 sm:$0xff]   ;;  %v4726_v30 = vrot.slane %v4668_v56, %v138_v19  ;;  %v4089_v49 = vld [vmem:[#allocation8 + $0x3a0] ss:$20 sps:$4 sm:$0xff]   ;;  %v4133_v19 = vld [vmem:[#allocation8 + $0x4bc] ss:$20 sps:$4 sm:$0xff]  }
 0x14e   :  { %2627 = vmatprep.subr.bf16.mxu0 %v4058_v33  ;;  %2839 = vmatprep.subr.bf16.mxu1 %v4061_v34  ;;  %v4707_v55 = vpack.c.bf16 %v396_v48, %v392_v39  ;;  %v4086_v48 = vld [vmem:[#allocation8 + $0x398] ss:$20 sps:$4 sm:$0xff]  }
 0x14f   :  { %2612 = vmatprep.mubr.bf16.mxu0 %v4701_v47  ;;  %2824 = vmatprep.mubr.bf16.mxu1 %v4701_v47  ;;  %v434_v57 = vpop.f32.mrb[8].mxu0  ;;  %v4711_v58 = vpack.c.bf16 %v398_v53, %v394_v42  ;;  %v4091_v42 = vld [vmem:[#allocation8 + $0x3a4] ss:$20 sps:$4 sm:$0xff]   ;;  %v4095_v53 = vld [vmem:[#allocation8 + $0x3c8] ss:$20 sps:$4 sm:$0xff]  }
 0x150   :  { %2613 = vmatmul.mubr.bf16.gmra.mrb[20].mxu0 %v4695_v41  ;;  %2825 = vmatmul.mubr.bf16.gmra.mrb[20].mxu1 %v4695_v41  ;;  %v435_v59 = vadd.f32 %v434_v57, %v4699_v44  ;;  %v436_v60 = vpop.f32.mrb[9].mxu0  ;;  %v4100_v57 = vld [vmem:[#allocation8 + $0x3ec] ss:$20 sps:$4 sm:$0xff]  }
 0x151   :  { %2628 = vmatpush1.bf16.msra.mxu0 %v4056_v45  ;;  %2840 = vmatpush1.bf16.msra.mxu1 %v4059_v46  ;;  %v437_v63 = vadd.f32 %v436_v60, %v135_v50  ;;  %v438_v1 = vpop.f32.mrb[10].mxu0  ;;  %v487_v20 = vpop.f32.mrb[8].mxu1  ;;  %v4098_v60 = vld [vmem:[#allocation8 + $0x3e8] ss:$20 sps:$4 sm:$0xff]  }
 0x152   :  { %2629 = vmatprep.subr.bf16.mxu0 %v4064_v51  ;;  %2841 = vmatprep.subr.bf16.mxu1 %v4067_v52  ;;  %v439_v0 = vadd.f32 %v438_v1, %v4699_v44  ;;  %v440_v4 = vpop.f32.mrb[11].mxu0  ;;  %v489_v28 = vpop.f32.mrb[9].mxu1  ;;  %v488_v37 = vadd.f32 %v487_v20, %v4726_v30  ;;  %v4097_v51 = vld [vmem:[#allocation8 + $0x3cc] ss:$20 sps:$4 sm:$0xff]   ;;  %v4104_v1 = vld [vmem:[#allocation8 + $0x410] ss:$20 sps:$4 sm:$0xff]  }
 0x153   :  { %2655 = vmatprep.mubr.bf16.mxu0 %v4691_v26  ;;  %2867 = vmatprep.mubr.bf16.mxu1 %v4691_v26  ;;  %v441_v5 = vadd.f32 %v440_v4, %v135_v50  ;;  %v491_v33 = vpop.f32.mrb[10].mxu1  ;;  %v490_v38 = vadd.f32 %v489_v28, %v4729_v32  ;;  %v4092_v52 = vld [vmem:[#allocation8 + $0x3c0] ss:$20 sps:$4 sm:$0xff]   ;;  %v4110_v4 = vld [vmem:[#allocation8 + $0x438] ss:$20 sps:$4 sm:$0xff]  }
 0x154   :  { %v4717_v6 = vpack.c.bf16 %v439_v0, %v435_v59  ;;  %v493_v39 = vpop.f32.mrb[11].mxu1  ;;  %v492_v56 = vadd.f32 %v491_v33, %v4726_v30  ;;  %v4103_v59 = vld [vmem:[#allocation8 + $0x3f4] ss:$20 sps:$4 sm:$0xff]   ;;  %v4115_v0 = vld [vmem:[#allocation8 + $0x444] ss:$20 sps:$4 sm:$0xff]  }
 0x155   :  { %2630 = vmatpush1.bf16.msra.mxu0 %v4062_v61  ;;  %2842 = vmatpush1.bf16.msra.mxu1 %v4065_v62  ;;  %v4719_v9 = vpack.c.bf16 %v441_v5, %v437_v63  ;;  %v4101_v61 = vld [vmem:[#allocation8 + $0x3f0] ss:$20 sps:$4 sm:$0xff]   ;;  %v4106_v62 = vld [vmem:[#allocation8 + $0x414] ss:$20 sps:$4 sm:$0xff]  }
 0x156   :  { %2631 = vmatprep.subr.bf16.mxu0 %v4070_v2  ;;  %2843 = vmatprep.subr.bf16.mxu1 %v4073_v3  ;;  %v4739_v45 = vpack.c.bf16 %v492_v56, %v488_v37  ;;  %v4109_v63 = vld [vmem:[#allocation8 + $0x41c] ss:$20 sps:$4 sm:$0xff]   ;;  %v4107_v2 = vld [vmem:[#allocation8 + $0x418] ss:$20 sps:$4 sm:$0xff]   ;;  %v4113_v5 = vld [vmem:[#allocation8 + $0x440] ss:$20 sps:$4 sm:$0xff]  }
 0x157   :  { %v444_v13 = vpop.f32.mrb[12].mxu0  ;;  %v4112_v3 = vld [vmem:[#allocation8 + $0x43c] ss:$20 sps:$4 sm:$0xff]   ;;  %v4142_v28 = vld [vmem:[#allocation8 + $0x504] ss:$20 sps:$4 sm:$0xff]  }
 0x158   :  { %v445_v17 = vadd.f32 %v444_v13, %v4699_v44  ;;  %v446_v18 = vpop.f32.mrb[13].mxu0  ;;  %v4124_v13 = vld [vmem:[#allocation8 + $0x48c] ss:$20 sps:$4 sm:$0xff]   ;;  %v4128_v20 = vld [vmem:[#allocation8 + $0x4b0] ss:$20 sps:$4 sm:$0xff]  }
 0x159   :  { %2632 = vmatpush1.bf16.msra.mxu0 %v4068_v7  ;;  %2844 = vmatpush1.bf16.msra.mxu1 %v4071_v8  ;;  %v447_v25 = vadd.f32 %v446_v18, %v135_v50  ;;  %v448_v27 = vpop.f32.mrb[14].mxu0  ;;  %v4118_v7 = vld [vmem:[#allocation8 + $0x464] ss:$20 sps:$4 sm:$0xff]   ;;  %v4121_v8 = vld [vmem:[#allocation8 + $0x46c] ss:$20 sps:$4 sm:$0xff]  }
 0x15a   :  { %2633 = vmatprep.subr.bf16.mxu0 %v4076_v10  ;;  %2845 = vmatprep.subr.bf16.mxu1 %v4079_v12  ;;  %v449_v29 = vadd.f32 %v448_v27, %v4699_v44  ;;  %v450_v31 = vpop.f32.mrb[15].mxu0  ;;  %v494_v44 = vadd.f32 %v493_v39, %v4729_v32  ;;  %v4116_v10 = vld [vmem:[#allocation8 + $0x460] ss:$20 sps:$4 sm:$0xff]   ;;  %v4119_v12 = vld [vmem:[#allocation8 + $0x468] ss:$20 sps:$4 sm:$0xff]  }
 0x15b   :  { %v451_v34 = vadd.f32 %v450_v31, %v135_v50  ;;  %v4094_v50 = vld [vmem:[#allocation8 + $0x3c4] ss:$20 sps:$4 sm:$0xff]   ;;  %v4130_v18 = vld [vmem:[#allocation8 + $0x4b4] ss:$20 sps:$4 sm:$0xff]  }
 0x15c   :  { %v4731_v36 = vpack.c.bf16 %v449_v29, %v445_v17  ;;  %v4741_v46 = vpack.c.bf16 %v494_v44, %v490_v38  ;;  %v4125_v17 = vld [vmem:[#allocation8 + $0x490] ss:$20 sps:$4 sm:$0xff]   ;;  %v4137_v27 = vld [vmem:[#allocation8 + $0x4e0] ss:$20 sps:$4 sm:$0xff]   ;;  %v4143_v33 = vld [vmem:[#allocation8 + $0x508] ss:$20 sps:$4 sm:$0xff]  }
 0x15d   :  { %2634 = vmatpush1.bf16.msra.mxu0 %v4074_v15  ;;  %2846 = vmatpush1.bf16.msra.mxu1 %v4077_v16  ;;  %v4735_v43 = vpack.c.bf16 %v451_v34, %v447_v25  ;;  %v4127_v15 = vld [vmem:[#allocation8 + $0x494] ss:$20 sps:$4 sm:$0xff]   ;;  %v4134_v25 = vld [vmem:[#allocation8 + $0x4d8] ss:$20 sps:$4 sm:$0xff]   ;;  %v497_v34 = vpop.f32.mrb[12].mxu1 }
 0x15e   :  { %2635 = vmatprep.subr.bf16.mxu0 %v4082_v22  ;;  %2847 = vmatprep.subr.bf16.mxu1 %v4085_v24  ;;  %v4122_v16 = vld [vmem:[#allocation8 + $0x488] ss:$20 sps:$4 sm:$0xff]   ;;  %v4139_v24 = vld [vmem:[#allocation8 + $0x4e4] ss:$20 sps:$4 sm:$0xff]   ;;  %v4145_v29 = vld [vmem:[#allocation8 + $0x50c] ss:$20 sps:$4 sm:$0xff]   ;;  %v498_v38 = vadd.f32 %v497_v34, %v4726_v30 }
 0x15f   :  { %v4136_v22 = vld [vmem:[#allocation8 + $0x4dc] ss:$20 sps:$4 sm:$0xff]   ;;  %v4140_v31 = vld [vmem:[#allocation8 + $0x500] ss:$20 sps:$4 sm:$0xff]   ;;  %v499_v37 = vpop.f32.mrb[13].mxu1 }
 0x160   :  { %v500_v39 = vadd.f32 %v499_v37, %v4729_v32  ;;  %v4149_v56 = vld [vmem:[#allocation8 + $0x530] ss:$20 sps:$4 sm:$0xff]   ;;  %v4209_v37 = vld [vmem:[#allocation8 + $0x6c0] ss:$20 sps:$4 sm:$0xff]  }
 0x161   :  { %2636 = vmatpush1.bf16.msra.mxu0 %v4080_v54  ;;  %2848 = vmatpush1.bf16.msra.mxu1 %v4083_v35  ;;  %v4148_v54 = vld [vmem:[#allocation8 + $0x52c] ss:$20 sps:$4 sm:$0xff]   ;;  %v4151_v35 = vld [vmem:[#allocation8 + $0x534] ss:$20 sps:$4 sm:$0xff]   ;;  %v4208_v34 = vld [vmem:[#allocation8 + $0x6bc] ss:$20 sps:$4 sm:$0xff]  }
 0x162   :  { %2637 = vmatprep.subr.bf16.mxu0 %v4088_v40  ;;  %2849 = vmatprep.subr.bf16.mxu1 %v4091_v42  ;;  %v501_v40 = vpop.f32.mrb[14].mxu1  ;;  %v4146_v42 = vld [vmem:[#allocation8 + $0x528] ss:$20 sps:$4 sm:$0xff]  }
 0x163   :  { %v502_v44 = vadd.f32 %v501_v40, %v4726_v30  ;;  %v4160_v30 = vld [vmem:[#allocation8 + $0x57c] ss:$20 sps:$4 sm:$0xff]   ;;  %v4212_v40 = vld [vmem:[#allocation8 + $0x6e0] ss:$20 sps:$4 sm:$0xff]  }
 0x165   :  { %2638 = vmatpush1.bf16.msra.mxu0 %v4086_v48  ;;  %2850 = vmatpush1.bf16.msra.mxu1 %v4089_v49  ;;  %v503_v48 = vpop.f32.mrb[15].mxu1  ;;  %v4154_v49 = vld [vmem:[#allocation8 + $0x554] ss:$20 sps:$4 sm:$0xff]  }
 0x166   :  { %2639 = vmatprep.subr.bf16.mxu0 %v4094_v50  ;;  %2851 = vmatprep.subr.bf16.mxu1 %v4097_v51  ;;  %v4157_v50 = vld [vmem:[#allocation8 + $0x55c] ss:$20 sps:$4 sm:$0xff]   ;;  %v504_v51 = vadd.f32 %v503_v48, %v4729_v32  ;;  %v4158_v32 = vld [vmem:[#allocation8 + $0x578] ss:$20 sps:$4 sm:$0xff]  }
 0x167   :  { %v4218_v48 = vld [vmem:[#allocation8 + $0x708] ss:$20 sps:$4 sm:$0xff]  }
 0x169   :  { %2640 = vmatpush1.bf16.msra.mxu0 %v4092_v52  ;;  %2852 = vmatpush1.bf16.msra.mxu1 %v4095_v53  ;;  %v4751_v52 = vpack.c.bf16 %v502_v44, %v498_v38  ;;  %v4753_v53 = vpack.c.bf16 %v504_v51, %v500_v39  ;;  %v4214_v38 = vld [vmem:[#allocation8 + $0x6e4] ss:$20 sps:$4 sm:$0xff]   ;;  %v4217_v39 = vld [vmem:[#allocation8 + $0x6ec] ss:$20 sps:$4 sm:$0xff]   ;;  %v4223_v44 = vld [vmem:[#allocation8 + $0x714] ss:$20 sps:$4 sm:$0xff]  }
 0x16a   :  { %2641 = vmatprep.subr.bf16.mxu0 %v4100_v57  ;;  %2853 = vmatprep.subr.bf16.mxu1 %v4103_v59  ;;  %v4152_v57 = vld [vmem:[#allocation8 + $0x550] ss:$20 sps:$4 sm:$0xff]   ;;  %v4155_v59 = vld [vmem:[#allocation8 + $0x558] ss:$20 sps:$4 sm:$0xff]  }
 0x16b   :  { %v4229_v51 = vld [vmem:[#allocation8 + $0x73c] ss:$20 sps:$4 sm:$0xff]  }
 0x16d   :  { %2642 = vmatpush1.bf16.msra.mxu0 %v4098_v60  ;;  %2854 = vmatpush1.bf16.msra.mxu1 %v4101_v61  ;;  %v4163_v60 = vld [vmem:[#allocation8 + $0x584] ss:$20 sps:$4 sm:$0xff]   ;;  %v4161_v61 = vld [vmem:[#allocation8 + $0x580] ss:$20 sps:$4 sm:$0xff]  }
 0x16e   :  { %2643 = vmatprep.subr.bf16.mxu0 %v4106_v62  ;;  %2855 = vmatprep.subr.bf16.mxu1 %v4109_v63  ;;  %v4166_v62 = vld [vmem:[#allocation8 + $0x5a4] ss:$20 sps:$4 sm:$0xff]   ;;  %v4169_v63 = vld [vmem:[#allocation8 + $0x5ac] ss:$20 sps:$4 sm:$0xff]  }
 0x171   :  { %2644 = vmatpush1.bf16.msra.mxu0 %v4104_v1  ;;  %2856 = vmatpush1.bf16.msra.mxu1 %v4107_v2  ;;  %v4164_v1 = vld [vmem:[#allocation8 + $0x5a0] ss:$20 sps:$4 sm:$0xff]   ;;  %v4167_v2 = vld [vmem:[#allocation8 + $0x5a8] ss:$20 sps:$4 sm:$0xff]  }
 0x172   :  { %2645 = vmatprep.subr.bf16.mxu0 %v4112_v3  ;;  %2857 = vmatprep.subr.bf16.mxu1 %v4115_v0  ;;  %v4172_v3 = vld [vmem:[#allocation8 + $0x5cc] ss:$20 sps:$4 sm:$0xff]   ;;  %v4175_v0 = vld [vmem:[#allocation8 + $0x5d4] ss:$20 sps:$4 sm:$0xff]  }
 0x175   :  { %2646 = vmatpush1.bf16.msra.mxu0 %v4110_v4  ;;  %2858 = vmatpush1.bf16.msra.mxu1 %v4113_v5  ;;  %v4170_v4 = vld [vmem:[#allocation8 + $0x5c8] ss:$20 sps:$4 sm:$0xff]   ;;  %v4173_v5 = vld [vmem:[#allocation8 + $0x5d0] ss:$20 sps:$4 sm:$0xff]  }
 0x176   :  { %2647 = vmatprep.subr.bf16.mxu0 %v4118_v7  ;;  %2859 = vmatprep.subr.bf16.mxu1 %v4121_v8  ;;  %v4178_v7 = vld [vmem:[#allocation8 + $0x5f4] ss:$20 sps:$4 sm:$0xff]   ;;  %v4181_v8 = vld [vmem:[#allocation8 + $0x5fc] ss:$20 sps:$4 sm:$0xff]  }
 0x179   :  { %2648 = vmatpush1.bf16.msra.mxu0 %v4116_v10  ;;  %2860 = vmatpush1.bf16.msra.mxu1 %v4119_v12  ;;  %v4176_v10 = vld [vmem:[#allocation8 + $0x5f0] ss:$20 sps:$4 sm:$0xff]   ;;  %v4179_v12 = vld [vmem:[#allocation8 + $0x5f8] ss:$20 sps:$4 sm:$0xff]  }
 0x17a   :  { %2649 = vmatprep.subr.bf16.mxu0 %v4124_v13  ;;  %2861 = vmatprep.subr.bf16.mxu1 %v4127_v15  ;;  %v4184_v13 = vld [vmem:[#allocation8 + $0x61c] ss:$20 sps:$4 sm:$0xff]   ;;  %v4187_v15 = vld [vmem:[#allocation8 + $0x624] ss:$20 sps:$4 sm:$0xff]  }
 0x17d   :  { %2650 = vmatpush1.bf16.msra.mxu0 %v4122_v16  ;;  %2862 = vmatpush1.bf16.msra.mxu1 %v4125_v17  ;;  %v4182_v16 = vld [vmem:[#allocation8 + $0x618] ss:$20 sps:$4 sm:$0xff]   ;;  %v4185_v17 = vld [vmem:[#allocation8 + $0x620] ss:$20 sps:$4 sm:$0xff]  }
 0x17e   :  { %2651 = vmatprep.subr.bf16.mxu0 %v4130_v18  ;;  %2863 = vmatprep.subr.bf16.mxu1 %v4133_v19  ;;  %v4190_v18 = vld [vmem:[#allocation8 + $0x644] ss:$20 sps:$4 sm:$0xff]   ;;  %v4193_v19 = vld [vmem:[#allocation8 + $0x64c] ss:$20 sps:$4 sm:$0xff]  }
 0x181   :  { %2652 = vmatpush1.bf16.msra.mxu0 %v4128_v20  ;;  %2864 = vmatpush1.bf16.msra.mxu1 %v4131_v21  ;;  %v4188_v20 = vld [vmem:[#allocation8 + $0x640] ss:$20 sps:$4 sm:$0xff]   ;;  %v4191_v21 = vld [vmem:[#allocation8 + $0x648] ss:$20 sps:$4 sm:$0xff]  }
 0x182   :  { %2653 = vmatprep.subr.bf16.mxu0 %v4136_v22  ;;  %2865 = vmatprep.subr.bf16.mxu1 %v4139_v24  ;;  %v4196_v22 = vld [vmem:[#allocation8 + $0x66c] ss:$20 sps:$4 sm:$0xff]   ;;  %v4199_v24 = vld [vmem:[#allocation8 + $0x674] ss:$20 sps:$4 sm:$0xff]  }
 0x185   :  { %2654 = vmatpush1.bf16.msra.mxu0 %v4134_v25  ;;  %2866 = vmatpush1.bf16.msra.mxu1 %v4137_v27  ;;  %v4194_v25 = vld [vmem:[#allocation8 + $0x668] ss:$20 sps:$4 sm:$0xff]   ;;  %v4197_v27 = vld [vmem:[#allocation8 + $0x670] ss:$20 sps:$4 sm:$0xff]  }
 0x186   :  { %2676 = vmatprep.subr.bf16.mxu0 %v4142_v28  ;;  %2888 = vmatprep.subr.bf16.mxu1 %v4145_v29  ;;  %v4202_v28 = vld [vmem:[#allocation8 + $0x694] ss:$20 sps:$4 sm:$0xff]   ;;  %v4205_v29 = vld [vmem:[#allocation8 + $0x69c] ss:$20 sps:$4 sm:$0xff]  }
 0x188   :  { %2656 = vmatmul.mubr.bf16.vlgmr.msra.gmra.mrb[16].mxu0 %v4687_v23  ;;  %2868 = vmatmul.mubr.bf16.vlgmr.msra.gmra.mrb[16].mxu1 %v4687_v23 }
 0x189   :  { %2677 = vmatpush1.bf16.msra.mxu0 %v4140_v31  ;;  %2889 = vmatpush1.bf16.msra.mxu1 %v4143_v33  ;;  %v4200_v31 = vld [vmem:[#allocation8 + $0x690] ss:$20 sps:$4 sm:$0xff]   ;;  %v4203_v33 = vld [vmem:[#allocation8 + $0x698] ss:$20 sps:$4 sm:$0xff]  }
 0x18a   :  { %2678 = vmatprep.subr.bf16.mxu0 %v4148_v54  ;;  %2890 = vmatprep.subr.bf16.mxu1 %v4151_v35  ;;  %v4211_v54 = vld [vmem:[#allocation8 + $0x6c4] ss:$20 sps:$4 sm:$0xff]  }
 0x18b   :  { %2665 = vmatprep.mubr.bf16.mxu0 %v4711_v58  ;;  %2877 = vmatprep.mubr.bf16.mxu1 %v4711_v58  ;;  %v4206_v35 = vld [vmem:[#allocation8 + $0x6b8] ss:$20 sps:$4 sm:$0xff]  }
 0x18d   :  { %2679 = vmatpush1.bf16.msra.mxu0 %v4146_v42  ;;  %2891 = vmatpush1.bf16.msra.mxu1 %v4149_v56  ;;  %v4215_v42 = vld [vmem:[#allocation8 + $0x6e8] ss:$20 sps:$4 sm:$0xff]   ;;  %v4220_v56 = vld [vmem:[#allocation8 + $0x70c] ss:$20 sps:$4 sm:$0xff]  }
 0x18e   :  { %2680 = vmatprep.subr.bf16.mxu0 %v4154_v49  ;;  %2892 = vmatprep.subr.bf16.mxu1 %v4157_v50  ;;  %v4221_v49 = vld [vmem:[#allocation8 + $0x710] ss:$20 sps:$4 sm:$0xff]   ;;  %v4226_v50 = vld [vmem:[#allocation8 + $0x734] ss:$20 sps:$4 sm:$0xff]  }
 0x190   :  { %2666 = vmatmul.mubr.bf16.gmra.mrb[20].mxu0 %v4707_v55  ;;  %2878 = vmatmul.mubr.bf16.gmra.mrb[20].mxu1 %v4707_v55 }
 0x191   :  { %2681 = vmatpush1.bf16.msra.mxu0 %v4152_v57  ;;  %2893 = vmatpush1.bf16.msra.mxu1 %v4155_v59  ;;  %v4224_v57 = vld [vmem:[#allocation8 + $0x730] ss:$20 sps:$4 sm:$0xff]   ;;  %v4227_v59 = vld [vmem:[#allocation8 + $0x738] ss:$20 sps:$4 sm:$0xff]  }
 0x192   :  { %2682 = vmatprep.subr.bf16.mxu0 %v4160_v30  ;;  %2894 = vmatprep.subr.bf16.mxu1 %v4163_v60  ;;  %v4232_v30 = vld [vmem:[#allocation8 + $0x75c] ss:$20 sps:$4 sm:$0xff]   ;;  %v4235_v60 = vld [vmem:[#allocation8 + $0x764] ss:$20 sps:$4 sm:$0xff]  }
 0x193   :  { %2708 = vmatprep.mubr.bf16.mxu0 %v4719_v9  ;;  %2920 = vmatprep.mubr.bf16.mxu1 %v4719_v9 }
 0x195   :  { %2683 = vmatpush1.bf16.msra.mxu0 %v4158_v32  ;;  %2895 = vmatpush1.bf16.msra.mxu1 %v4161_v61  ;;  %v4230_v32 = vld [vmem:[#allocation8 + $0x758] ss:$20 sps:$4 sm:$0xff]   ;;  %v4233_v61 = vld [vmem:[#allocation8 + $0x760] ss:$20 sps:$4 sm:$0xff]  }
 0x196   :  { %2684 = vmatprep.subr.bf16.mxu0 %v4166_v62  ;;  %2896 = vmatprep.subr.bf16.mxu1 %v4169_v63  ;;  %v4238_v62 = vld [vmem:[#allocation8 + $0x784] ss:$20 sps:$4 sm:$0xff]   ;;  %v4241_v63 = vld [vmem:[#allocation8 + $0x78c] ss:$20 sps:$4 sm:$0xff]  }
 0x199   :  { %2685 = vmatpush1.bf16.msra.mxu0 %v4164_v1  ;;  %2897 = vmatpush1.bf16.msra.mxu1 %v4167_v2  ;;  %v4236_v1 = vld [vmem:[#allocation8 + $0x780] ss:$20 sps:$4 sm:$0xff]   ;;  %v4239_v2 = vld [vmem:[#allocation8 + $0x788] ss:$20 sps:$4 sm:$0xff]  }
 0x19a   :  { %2686 = vmatprep.subr.bf16.mxu0 %v4172_v3  ;;  %2898 = vmatprep.subr.bf16.mxu1 %v4175_v0  ;;  %v4244_v3 = vld [vmem:[#allocation8 + $0x7ac] ss:$20 sps:$4 sm:$0xff]   ;;  %v4247_v0 = vld [vmem:[#allocation8 + $0x7b4] ss:$20 sps:$4 sm:$0xff]  }
 0x19d   :  { %2687 = vmatpush1.bf16.msra.mxu0 %v4170_v4  ;;  %2899 = vmatpush1.bf16.msra.mxu1 %v4173_v5  ;;  %v4242_v4 = vld [vmem:[#allocation8 + $0x7a8] ss:$20 sps:$4 sm:$0xff]   ;;  %v4245_v5 = vld [vmem:[#allocation8 + $0x7b0] ss:$20 sps:$4 sm:$0xff]  }
 0x19e   :  { %2688 = vmatprep.subr.bf16.mxu0 %v4178_v7  ;;  %2900 = vmatprep.subr.bf16.mxu1 %v4181_v8  ;;  %v4250_v7 = vld [vmem:[#allocation8 + $0x7d4] ss:$20 sps:$4 sm:$0xff]   ;;  %v4253_v8 = vld [vmem:[#allocation8 + $0x7dc] ss:$20 sps:$4 sm:$0xff]  }
 0x1a1   :  { %2689 = vmatpush1.bf16.msra.mxu0 %v4176_v10  ;;  %2901 = vmatpush1.bf16.msra.mxu1 %v4179_v12  ;;  %v4248_v10 = vld [vmem:[#allocation8 + $0x7d0] ss:$20 sps:$4 sm:$0xff]   ;;  %v4251_v12 = vld [vmem:[#allocation8 + $0x7d8] ss:$20 sps:$4 sm:$0xff]  }
 0x1a2   :  { %2690 = vmatprep.subr.bf16.mxu0 %v4184_v13  ;;  %2902 = vmatprep.subr.bf16.mxu1 %v4187_v15  ;;  %v4256_v13 = vld [vmem:[#allocation8 + $0x7fc] ss:$20 sps:$4 sm:$0xff]   ;;  %v4259_v15 = vld [vmem:[#allocation8 + $0x804] ss:$20 sps:$4 sm:$0xff]  }
 0x1a5   :  { %2691 = vmatpush1.bf16.msra.mxu0 %v4182_v16  ;;  %2903 = vmatpush1.bf16.msra.mxu1 %v4185_v17  ;;  %v4254_v16 = vld [vmem:[#allocation8 + $0x7f8] ss:$20 sps:$4 sm:$0xff]   ;;  %v4257_v17 = vld [vmem:[#allocation8 + $0x800] ss:$20 sps:$4 sm:$0xff]  }
 0x1a6   :  { %2692 = vmatprep.subr.bf16.mxu0 %v4190_v18  ;;  %2904 = vmatprep.subr.bf16.mxu1 %v4193_v19  ;;  %v4262_v18 = vld [vmem:[#allocation8 + $0x824] ss:$20 sps:$4 sm:$0xff]   ;;  %v4265_v19 = vld [vmem:[#allocation8 + $0x82c] ss:$20 sps:$4 sm:$0xff]  }
 0x1a9   :  { %2693 = vmatpush1.bf16.msra.mxu0 %v4188_v20  ;;  %2905 = vmatpush1.bf16.msra.mxu1 %v4191_v21  ;;  %v4260_v20 = vld [vmem:[#allocation8 + $0x820] ss:$20 sps:$4 sm:$0xff]   ;;  %v4263_v21 = vld [vmem:[#allocation8 + $0x828] ss:$20 sps:$4 sm:$0xff]  }
 0x1aa   :  { %2694 = vmatprep.subr.bf16.mxu0 %v4196_v22  ;;  %2906 = vmatprep.subr.bf16.mxu1 %v4199_v24  ;;  %v4268_v22 = vld [vmem:[#allocation8 + $0x84c] ss:$20 sps:$4 sm:$0xff]   ;;  %v4271_v24 = vld [vmem:[#allocation8 + $0x854] ss:$20 sps:$4 sm:$0xff]  }
 0x1ad   :  { %2695 = vmatpush1.bf16.msra.mxu0 %v4194_v25  ;;  %2907 = vmatpush1.bf16.msra.mxu1 %v4197_v27  ;;  %v4266_v25 = vld [vmem:[#allocation8 + $0x848] ss:$20 sps:$4 sm:$0xff]   ;;  %v4269_v27 = vld [vmem:[#allocation8 + $0x850] ss:$20 sps:$4 sm:$0xff]  }
 0x1ae   :  { %2696 = vmatprep.subr.bf16.mxu0 %v4202_v28  ;;  %2908 = vmatprep.subr.bf16.mxu1 %v4205_v29  ;;  %v4274_v28 = vld [vmem:[#allocation8 + $0x874] ss:$20 sps:$4 sm:$0xff]   ;;  %v4277_v29 = vld [vmem:[#allocation8 + $0x87c] ss:$20 sps:$4 sm:$0xff]  }
 0x1b1   :  { %2697 = vmatpush1.bf16.msra.mxu0 %v4200_v31  ;;  %2909 = vmatpush1.bf16.msra.mxu1 %v4203_v33  ;;  %v4272_v31 = vld [vmem:[#allocation8 + $0x870] ss:$20 sps:$4 sm:$0xff]   ;;  %v4275_v33 = vld [vmem:[#allocation8 + $0x878] ss:$20 sps:$4 sm:$0xff]  }
 0x1b2   :  { %2698 = vmatprep.subr.bf16.mxu0 %v4208_v34  ;;  %2910 = vmatprep.subr.bf16.mxu1 %v4211_v54  ;;  %v4280_v34 = vld [vmem:[#allocation8 + $0x89c] ss:$20 sps:$4 sm:$0xff]   ;;  %v4283_v54 = vld [vmem:[#allocation8 + $0x8a4] ss:$20 sps:$4 sm:$0xff]  }
 0x1b5   :  { %2699 = vmatpush1.bf16.msra.mxu0 %v4206_v35  ;;  %2911 = vmatpush1.bf16.msra.mxu1 %v4209_v37  ;;  %v4278_v35 = vld [vmem:[#allocation8 + $0x898] ss:$20 sps:$4 sm:$0xff]   ;;  %v4281_v37 = vld [vmem:[#allocation8 + $0x8a0] ss:$20 sps:$4 sm:$0xff]  }
 0x1b6   :  { %2700 = vmatprep.subr.bf16.mxu0 %v4214_v38  ;;  %2912 = vmatprep.subr.bf16.mxu1 %v4217_v39  ;;  %v4286_v38 = vld [vmem:[#allocation8 + $0x8c4] ss:$20 sps:$4 sm:$0xff]   ;;  %v4289_v39 = vld [vmem:[#allocation8 + $0x8cc] ss:$20 sps:$4 sm:$0xff]  }
 0x1b9   :  { %2701 = vmatpush1.bf16.msra.mxu0 %v4212_v40  ;;  %2913 = vmatpush1.bf16.msra.mxu1 %v4215_v42  ;;  %v4284_v40 = vld [vmem:[#allocation8 + $0x8c0] ss:$20 sps:$4 sm:$0xff]   ;;  %v4287_v42 = vld [vmem:[#allocation8 + $0x8c8] ss:$20 sps:$4 sm:$0xff]  }
 0x1ba   :  { %2702 = vmatprep.subr.bf16.mxu0 %v4220_v56  ;;  %2914 = vmatprep.subr.bf16.mxu1 %v4223_v44  ;;  %v4292_v56 = vld [vmem:[#allocation8 + $0x8ec] ss:$20 sps:$4 sm:$0xff]   ;;  %v4295_v44 = vld [vmem:[#allocation8 + $0x8f4] ss:$20 sps:$4 sm:$0xff]  }
 0x1bd   :  { %2703 = vmatpush1.bf16.msra.mxu0 %v4218_v48  ;;  %2915 = vmatpush1.bf16.msra.mxu1 %v4221_v49  ;;  %v4290_v48 = vld [vmem:[#allocation8 + $0x8e8] ss:$20 sps:$4 sm:$0xff]   ;;  %v4293_v49 = vld [vmem:[#allocation8 + $0x8f0] ss:$20 sps:$4 sm:$0xff]  }
 0x1be   :  { %2704 = vmatprep.subr.bf16.mxu0 %v4226_v50  ;;  %2916 = vmatprep.subr.bf16.mxu1 %v4229_v51  ;;  %v4298_v50 = vld [vmem:[#allocation8 + $0x914] ss:$20 sps:$4 sm:$0xff]   ;;  %v4301_v51 = vld [vmem:[#allocation8 + $0x91c] ss:$20 sps:$4 sm:$0xff]  }
 0x1c1   :  { %2705 = vmatpush1.bf16.msra.mxu0 %v4224_v57  ;;  %2917 = vmatpush1.bf16.msra.mxu1 %v4227_v59  ;;  %v4296_v57 = vld [vmem:[#allocation8 + $0x910] ss:$20 sps:$4 sm:$0xff]   ;;  %v4299_v59 = vld [vmem:[#allocation8 + $0x918] ss:$20 sps:$4 sm:$0xff]  }
 0x1c2   :  { %2706 = vmatprep.subr.bf16.mxu0 %v4232_v30  ;;  %2918 = vmatprep.subr.bf16.mxu1 %v4235_v60  ;;  %v4304_v30 = vld [vmem:[#allocation8 + $0x93c] ss:$20 sps:$4 sm:$0xff]   ;;  %v4307_v60 = vld [vmem:[#allocation8 + $0x944] ss:$20 sps:$4 sm:$0xff]  }
 0x1c5   :  { %2707 = vmatpush1.bf16.msra.mxu0 %v4230_v32  ;;  %2919 = vmatpush1.bf16.msra.mxu1 %v4233_v61  ;;  %v4302_v32 = vld [vmem:[#allocation8 + $0x938] ss:$20 sps:$4 sm:$0xff]   ;;  %v4305_v61 = vld [vmem:[#allocation8 + $0x940] ss:$20 sps:$4 sm:$0xff]  }
 0x1c6   :  { %2729 = vmatprep.subr.bf16.mxu0 %v4238_v62  ;;  %2941 = vmatprep.subr.bf16.mxu1 %v4241_v63  ;;  %v4310_v62 = vld [vmem:[#allocation8 + $0x964] ss:$20 sps:$4 sm:$0xff]   ;;  %v4313_v63 = vld [vmem:[#allocation8 + $0x96c] ss:$20 sps:$4 sm:$0xff]  }
 0x1c8   :  { %2709 = vmatmul.mubr.bf16.vlgmr.msra.gmra.mrb[16].mxu0 %v4717_v6  ;;  %2921 = vmatmul.mubr.bf16.vlgmr.msra.gmra.mrb[16].mxu1 %v4717_v6 }
 0x1c9   :  { %2730 = vmatpush1.bf16.msra.mxu0 %v4236_v1  ;;  %2942 = vmatpush1.bf16.msra.mxu1 %v4239_v2  ;;  %v4308_v1 = vld [vmem:[#allocation8 + $0x960] ss:$20 sps:$4 sm:$0xff]   ;;  %v4311_v2 = vld [vmem:[#allocation8 + $0x968] ss:$20 sps:$4 sm:$0xff]  }
 0x1ca   :  { %2731 = vmatprep.subr.bf16.mxu0 %v4244_v3  ;;  %2943 = vmatprep.subr.bf16.mxu1 %v4247_v0  ;;  %v4316_v3 = vld [vmem:[#allocation8 + $0x98c] ss:$20 sps:$4 sm:$0xff]   ;;  %v4319_v0 = vld [vmem:[#allocation8 + $0x994] ss:$20 sps:$4 sm:$0xff]  }
 0x1cb   :  { %2718 = vmatprep.mubr.bf16.mxu0 %v4735_v43  ;;  %2930 = vmatprep.mubr.bf16.mxu1 %v4735_v43 }
 0x1cd   :  { %2732 = vmatpush1.bf16.msra.mxu0 %v4242_v4  ;;  %2944 = vmatpush1.bf16.msra.mxu1 %v4245_v5  ;;  %v4314_v4 = vld [vmem:[#allocation8 + $0x988] ss:$20 sps:$4 sm:$0xff]   ;;  %v4317_v5 = vld [vmem:[#allocation8 + $0x990] ss:$20 sps:$4 sm:$0xff]  }
 0x1ce   :  { %2733 = vmatprep.subr.bf16.mxu0 %v4250_v7  ;;  %2945 = vmatprep.subr.bf16.mxu1 %v4253_v8  ;;  %v4322_v7 = vld [vmem:[#allocation8 + $0x9b4] ss:$20 sps:$4 sm:$0xff]   ;;  %v4325_v8 = vld [vmem:[#allocation8 + $0x9bc] ss:$20 sps:$4 sm:$0xff]  }
 0x1d0   :  { %2719 = vmatmul.mubr.bf16.gmra.mrb[20].mxu0 %v4731_v36  ;;  %2931 = vmatmul.mubr.bf16.gmra.mrb[20].mxu1 %v4731_v36 }
 0x1d1   :  { %2734 = vmatpush1.bf16.msra.mxu0 %v4248_v10  ;;  %2946 = vmatpush1.bf16.msra.mxu1 %v4251_v12  ;;  %v4320_v10 = vld [vmem:[#allocation8 + $0x9b0] ss:$20 sps:$4 sm:$0xff]   ;;  %v4323_v12 = vld [vmem:[#allocation8 + $0x9b8] ss:$20 sps:$4 sm:$0xff]  }
 0x1d2   :  { %2735 = vmatprep.subr.bf16.mxu0 %v4256_v13  ;;  %2947 = vmatprep.subr.bf16.mxu1 %v4259_v15  ;;  %v4328_v13 = vld [vmem:[#allocation8 + $0x9dc] ss:$20 sps:$4 sm:$0xff]   ;;  %v4331_v15 = vld [vmem:[#allocation8 + $0x9e4] ss:$20 sps:$4 sm:$0xff]  }
 0x1d3   :  { %2761 = vmatprep.mubr.bf16.mxu0 %v4741_v46  ;;  %2973 = vmatprep.mubr.bf16.mxu1 %v4741_v46 }
 0x1d5   :  { %2736 = vmatpush1.bf16.msra.mxu0 %v4254_v16  ;;  %2948 = vmatpush1.bf16.msra.mxu1 %v4257_v17  ;;  %v4326_v16 = vld [vmem:[#allocation8 + $0x9d8] ss:$20 sps:$4 sm:$0xff]   ;;  %v4329_v17 = vld [vmem:[#allocation8 + $0x9e0] ss:$20 sps:$4 sm:$0xff]  }
 0x1d6   :  { %2737 = vmatprep.subr.bf16.mxu0 %v4262_v18  ;;  %2949 = vmatprep.subr.bf16.mxu1 %v4265_v19  ;;  %v4332_v18 = vld [vmem:[#allocation8 + $0x150] ss:$20 sps:$4 sm:$0xff]  }
 0x1d7   :  { %v4333_v19 = vld [vmem:[#allocation8 + $0x3d0] ss:$20 sps:$4 sm:$0xff]  }
 0x1d9   :  { %2738 = vmatpush1.bf16.msra.mxu0 %v4260_v20  ;;  %2950 = vmatpush1.bf16.msra.mxu1 %v4263_v21  ;;  %v4334_v20 = vld [vmem:[#allocation8 + $0x10] ss:$20 sps:$4 sm:$0xff]  }
 0x1da   :  { %2739 = vmatprep.subr.bf16.mxu0 %v4268_v22  ;;  %2951 = vmatprep.subr.bf16.mxu1 %v4271_v24  ;;  %v4335_v21 = vld [vmem:[#allocation8 + $0x290] ss:$20 sps:$4 sm:$0xff]   ;;  %v4336_v22 = vld [vmem:[#allocation8 + $0x178] ss:$20 sps:$4 sm:$0xff]  }
 0x1db   :  { %v4337_v24 = vld [vmem:[#allocation8 + $0x3f8] ss:$20 sps:$4 sm:$0xff]  }
 0x1dd   :  { %2740 = vmatpush1.bf16.msra.mxu0 %v4266_v25  ;;  %2952 = vmatpush1.bf16.msra.mxu1 %v4269_v27  ;;  %v4338_v25 = vld [vmem:[#allocation8 + $0x38] ss:$20 sps:$4 sm:$0xff]  }
 0x1de   :  { %2741 = vmatprep.subr.bf16.mxu0 %v4274_v28  ;;  %2953 = vmatprep.subr.bf16.mxu1 %v4277_v29  ;;  %v4339_v27 = vld [vmem:[#allocation8 + $0x2b8] ss:$20 sps:$4 sm:$0xff]   ;;  %v4340_v28 = vld [vmem:[#allocation8 + $0x1a0] ss:$20 sps:$4 sm:$0xff]  }
 0x1df   :  { %v4341_v29 = vld [vmem:[#allocation8 + $0x420] ss:$20 sps:$4 sm:$0xff]  }
 0x1e1   :  { %2742 = vmatpush1.bf16.msra.mxu0 %v4272_v31  ;;  %2954 = vmatpush1.bf16.msra.mxu1 %v4275_v33  ;;  %v4342_v31 = vld [vmem:[#allocation8 + $0x60] ss:$20 sps:$4 sm:$0xff]  }
 0x1e2   :  { %2743 = vmatprep.subr.bf16.mxu0 %v4280_v34  ;;  %2955 = vmatprep.subr.bf16.mxu1 %v4283_v54  ;;  %v4343_v33 = vld [vmem:[#allocation8 + $0x2e0] ss:$20 sps:$4 sm:$0xff]   ;;  %v4344_v34 = vld [vmem:[#allocation8 + $0x1c8] ss:$20 sps:$4 sm:$0xff]  }
 0x1e3   :  { %v4345_v54 = vld [vmem:[#allocation8 + $0x448] ss:$20 sps:$4 sm:$0xff]  }
 0x1e5   :  { %2744 = vmatpush1.bf16.msra.mxu0 %v4278_v35  ;;  %2956 = vmatpush1.bf16.msra.mxu1 %v4281_v37  ;;  %v4346_v35 = vld [vmem:[#allocation8 + $0x88] ss:$20 sps:$4 sm:$0xff]  }
 0x1e6   :  { %2745 = vmatprep.subr.bf16.mxu0 %v4286_v38  ;;  %2957 = vmatprep.subr.bf16.mxu1 %v4289_v39  ;;  %v4347_v37 = vld [vmem:[#allocation8 + $0x308] ss:$20 sps:$4 sm:$0xff]   ;;  %v4348_v38 = vld [vmem:[#allocation8 + $0x1f0] ss:$20 sps:$4 sm:$0xff]  }
 0x1e7   :  { %v4349_v39 = vld [vmem:[#allocation8 + $0x470] ss:$20 sps:$4 sm:$0xff]  }
 0x1e9   :  { %2746 = vmatpush1.bf16.msra.mxu0 %v4284_v40  ;;  %2958 = vmatpush1.bf16.msra.mxu1 %v4287_v42  ;;  %v4350_v40 = vld [vmem:[#allocation8 + $0xb0] ss:$20 sps:$4 sm:$0xff]  }
 0x1ea   :  { %2747 = vmatprep.subr.bf16.mxu0 %v4292_v56  ;;  %2959 = vmatprep.subr.bf16.mxu1 %v4295_v44  ;;  %v4351_v42 = vld [vmem:[#allocation8 + $0x330] ss:$20 sps:$4 sm:$0xff]   ;;  %v4352_v56 = vld [vmem:[#allocation8 + $0x218] ss:$20 sps:$4 sm:$0xff]  }
 0x1eb   :  { %v4353_v44 = vld [vmem:[#allocation8 + $0x498] ss:$20 sps:$4 sm:$0xff]  }
 0x1ed   :  { %2748 = vmatpush1.bf16.msra.mxu0 %v4290_v48  ;;  %2960 = vmatpush1.bf16.msra.mxu1 %v4293_v49  ;;  %v4354_v48 = vld [vmem:[#allocation8 + $0xd8] ss:$20 sps:$4 sm:$0xff]   ;;  %v4356_v49 = vld [vmem:[#allocation8 + $0x240] ss:$20 sps:$4 sm:$0xff]  }
 0x1ee   :  { %2749 = vmatprep.subr.bf16.mxu0 %v4298_v50  ;;  %2961 = vmatprep.subr.bf16.mxu1 %v4301_v51  ;;  %v4358_v50 = vld [vmem:[#allocation8 + $0x100] ss:$20 sps:$4 sm:$0xff]  }
 0x1ef   :  { %v4359_v51 = vld [vmem:[#allocation8 + $0x380] ss:$20 sps:$4 sm:$0xff]  }
 0x1f1   :  { %2750 = vmatpush1.bf16.msra.mxu0 %v4296_v57  ;;  %2962 = vmatpush1.bf16.msra.mxu1 %v4299_v59  ;;  %v4360_v57 = vld [vmem:[#allocation8 + $0x268] ss:$20 sps:$4 sm:$0xff]  }
 0x1f2   :  { %2751 = vmatprep.subr.bf16.mxu0 %v4304_v30  ;;  %2963 = vmatprep.subr.bf16.mxu1 %v4307_v60  ;;  %v4361_v59 = vld [vmem:[#allocation8 + $0x4e8] ss:$20 sps:$4 sm:$0xff]  }
 0x1f3   :  { %v4362_v30 = vld [vmem:[#allocation8 + $0x128] ss:$20 sps:$4 sm:$0xff]  }
 0x1f4   :  { %v4363_v60 = vld [vmem:[#allocation8 + $0x3a8] ss:$20 sps:$4 sm:$0xff]  }
 0x1f5   :  { %2752 = vmatpush1.bf16.msra.mxu0 %v4302_v32  ;;  %2964 = vmatpush1.bf16.msra.mxu1 %v4305_v61  ;;  %v4364_v32 = vld [vmem:[#allocation8 + $0x650] ss:$20 sps:$4 sm:$0xff]  }
 0x1f6   :  { %2753 = vmatprep.subr.bf16.mxu0 %v4310_v62  ;;  %2965 = vmatprep.subr.bf16.mxu1 %v4313_v63  ;;  %v4365_v61 = vld [vmem:[#allocation8 + $0x8d0] ss:$20 sps:$4 sm:$0xff]  }
 0x1f7   :  { %v4366_v62 = vld [vmem:[#allocation8 + $0x510] ss:$20 sps:$4 sm:$0xff]  }
 0x1f8   :  { %v4367_v63 = vld [vmem:[#allocation8 + $0x790] ss:$20 sps:$4 sm:$0xff]  }
 0x1f9   :  { %2754 = vmatpush1.bf16.msra.mxu0 %v4308_v1  ;;  %2966 = vmatpush1.bf16.msra.mxu1 %v4311_v2  ;;  %v4368_v1 = vld [vmem:[#allocation8 + $0x678] ss:$20 sps:$4 sm:$0xff]  }
 0x1fa   :  { %2755 = vmatprep.subr.bf16.mxu0 %v4316_v3  ;;  %2967 = vmatprep.subr.bf16.mxu1 %v4319_v0  ;;  %v4369_v2 = vld [vmem:[#allocation8 + $0x8f8] ss:$20 sps:$4 sm:$0xff]  }
 0x1fb   :  { %v4370_v3 = vld [vmem:[#allocation8 + $0x538] ss:$20 sps:$4 sm:$0xff]  }
 0x1fc   :  { %v4371_v0 = vld [vmem:[#allocation8 + $0x7b8] ss:$20 sps:$4 sm:$0xff]  }
 0x1fd   :  { %2756 = vmatpush1.bf16.msra.mxu0 %v4314_v4  ;;  %2968 = vmatpush1.bf16.msra.mxu1 %v4317_v5  ;;  %v4372_v4 = vld [vmem:[#allocation8 + $0x6a0] ss:$20 sps:$4 sm:$0xff]  }
 0x1fe   :  { %2757 = vmatprep.subr.bf16.mxu0 %v4322_v7  ;;  %2969 = vmatprep.subr.bf16.mxu1 %v4325_v8  ;;  %v4373_v5 = vld [vmem:[#allocation8 + $0x920] ss:$20 sps:$4 sm:$0xff]   ;;  %v4376_v8 = vld [vmem:[#allocation8 + $0x6c8] ss:$20 sps:$4 sm:$0xff]  }
 0x1ff   :  { %v4374_v7 = vld [vmem:[#allocation8 + $0x560] ss:$20 sps:$4 sm:$0xff]  }
 0x201   :  { %2758 = vmatpush1.bf16.msra.mxu0 %v4320_v10  ;;  %2970 = vmatpush1.bf16.msra.mxu1 %v4323_v12  ;;  %v4380_v10 = vld [vmem:[#allocation8 + $0x6f0] ss:$20 sps:$4 sm:$0xff]  }
 0x202   :  { %2759 = vmatprep.subr.bf16.mxu0 %v4328_v13  ;;  %2971 = vmatprep.subr.bf16.mxu1 %v4331_v15  ;;  %v4381_v12 = vld [vmem:[#allocation8 + $0x970] ss:$20 sps:$4 sm:$0xff]   ;;  %v4384_v15 = vld [vmem:[#allocation8 + $0x718] ss:$20 sps:$4 sm:$0xff]  }
 0x203   :  { %v4382_v13 = vld [vmem:[#allocation8 + $0x5b0] ss:$20 sps:$4 sm:$0xff]  }
 0x205   :  { %2760 = vmatpush1.bf16.msra.mxu0 %v4326_v16  ;;  %2972 = vmatpush1.bf16.msra.mxu1 %v4329_v17  ;;  %v4388_v16 = vld [vmem:[#allocation8 + $0x740] ss:$20 sps:$4 sm:$0xff]  }
 0x206   :  { %3763 = vmatprep.subr.bf16.mxu0 %v4332_v18  ;;  %3791 = vmatprep.subr.bf16.mxu1 %v4333_v19  ;;  %v4389_v17 = vld [vmem:[#allocation8 + $0x9c0] ss:$20 sps:$4 sm:$0xff]  }
 0x207   :  { %v4390_v18 = vld [vmem:[#allocation8 + $0x600] ss:$20 sps:$4 sm:$0xff]  }
 0x208   :  { %2762 = vmatmul.mubr.bf16.vlgmr.msra.gmra.mrb[16].mxu0 %v4739_v45  ;;  %2974 = vmatmul.mubr.bf16.vlgmr.msra.gmra.mrb[16].mxu1 %v4739_v45  ;;  %v4391_v19 = vld [vmem:[#allocation8 + $0x880] ss:$20 sps:$4 sm:$0xff]  }
 0x209   :  { %3764 = vmatpush3.bf16.msra.mxu0 %v4334_v20  ;;  %3792 = vmatpush3.bf16.msra.mxu1 %v4335_v21  ;;  %v4392_v20 = vld [vmem:[#allocation8 + $0x768] ss:$20 sps:$4 sm:$0xff]  }
 0x20a   :  { %3765 = vmatprep.subr.bf16.mxu0 %v4336_v22  ;;  %3793 = vmatprep.subr.bf16.mxu1 %v4337_v24  ;;  %v4393_v21 = vld [vmem:[#allocation8 + $0x9e8] ss:$20 sps:$4 sm:$0xff]  }
 0x20b   :  { %2771 = vmatprep.mubr.bf16.mxu0 %v4753_v53  ;;  %2983 = vmatprep.mubr.bf16.mxu1 %v4753_v53  ;;  %v4394_v22 = vld [vmem:[#allocation8 + $0x628] ss:$20 sps:$4 sm:$0xff]  }
 0x20c   :  { %v4395_v24 = vld [vmem:[#allocation8 + $0x8a8] ss:$20 sps:$4 sm:$0xff]  }
 0x20d   :  { %3766 = vmatpush3.bf16.msra.mxu0 %v4338_v25  ;;  %3794 = vmatpush3.bf16.msra.mxu1 %v4339_v27 }
 0x20e   :  { %3767 = vmatprep.subr.bf16.mxu0 %v4340_v28  ;;  %3795 = vmatprep.subr.bf16.mxu1 %v4341_v29 }
 0x210   :  { %2772 = vmatmul.mubr.bf16.gmra.mrb[20].mxu0 %v4751_v52  ;;  %2984 = vmatmul.mubr.bf16.gmra.mrb[20].mxu1 %v4751_v52 }
 0x211   :  { %3768 = vmatpush3.bf16.msra.mxu0 %v4342_v31  ;;  %3026 = vmatprep.mubr.bf16.mxu0 %v4682_v14  ;;  %v4355_v14 = vld [vmem:[#allocation8 + $0x358] ss:$20 sps:$4 sm:$0xff]  }
 0x212   :  { %3796 = vmatpush3.bf16.msra.mxu1 %v4343_v33  ;;  %3075 = vmatprep.mubr.bf16.mxu1 %v4691_v26  ;;  %v4357_v26 = vld [vmem:[#allocation8 + $0x4c0] ss:$20 sps:$4 sm:$0xff]  }
 0x213   :  { %3769 = vmatprep.subr.bf16.mxu0 %v4344_v34  ;;  %3797 = vmatprep.subr.bf16.mxu1 %v4345_v54 }
 0x215   :  { %3770 = vmatpush3.bf16.msra.mxu0 %v4346_v35 }
 0x216   :  { %3798 = vmatpush3.bf16.msra.mxu1 %v4347_v37  ;;  %3771 = vmatprep.subr.bf16.mxu0 %v4348_v38 }
 0x217   :  { %3799 = vmatprep.subr.bf16.mxu1 %v4349_v39 }
 0x219   :  { %3772 = vmatpush3.bf16.msra.mxu0 %v4350_v40 }
 0x21a   :  { %3800 = vmatpush3.bf16.msra.mxu1 %v4351_v42  ;;  %3773 = vmatprep.subr.bf16.mxu0 %v4352_v56 }
 0x21b   :  { %3801 = vmatprep.subr.bf16.mxu1 %v4353_v44 }
 0x21d   :  { %3774 = vmatpush3.bf16.msra.mxu0 %v4354_v48 }
 0x21e   :  { %3802 = vmatpush3.bf16.msra.mxu1 %v4355_v14  ;;  %3775 = vmatprep.subr.bf16.mxu0 %v4356_v49 }
 0x21f   :  { %3803 = vmatprep.subr.bf16.mxu1 %v4357_v26 }
 0x221   :  { %3776 = vmatpush3.bf16.msra.mxu0 %v4358_v50 }
 0x222   :  { %3804 = vmatpush3.bf16.msra.mxu1 %v4359_v51  ;;  %3777 = vmatprep.subr.bf16.mxu0 %v4360_v57 }
 0x223   :  { %3805 = vmatprep.subr.bf16.mxu1 %v4361_v59 }
 0x225   :  { %3778 = vmatpush3.bf16.msra.mxu0 %v4362_v30 }
 0x226   :  { %3806 = vmatpush3.bf16.msra.mxu1 %v4363_v60  ;;  %3819 = vmatprep.subr.bf16.mxu0 %v4364_v32 }
 0x227   :  { %3847 = vmatprep.subr.bf16.mxu1 %v4365_v61 }
 0x228   :  { %3027 = vmatmul.mubr.bf16.vlgmr.msra.gmra.mrb[24].mxu0 %v4679_v11  ;;  %v4375_v11 = vld [vmem:[#allocation8 + $0x7e0] ss:$20 sps:$4 sm:$0xff]  }
 0x229   :  { %3076 = vmatmul.mubr.bf16.vlgmr.msra.gmra.mrb[24].mxu1 %v4687_v23  ;;  %3034 = vmatprep.mubr.bf16.mxu0 %v4701_v47  ;;  %v4377_v23 = vld [vmem:[#allocation8 + $0x948] ss:$20 sps:$4 sm:$0xff]  }
 0x22a   :  { %3083 = vmatprep.mubr.bf16.mxu1 %v4711_v58  ;;  %3820 = vmatpush3.bf16.msra.mxu0 %v4366_v62  ;;  %v4378_v47 = vld [vmem:[#allocation8 + $0x588] ss:$20 sps:$4 sm:$0xff]  }
 0x22b   :  { %3848 = vmatpush3.bf16.msra.mxu1 %v4367_v63  ;;  %3821 = vmatprep.subr.bf16.mxu0 %v4368_v1  ;;  %v4379_v58 = vld [vmem:[#allocation8 + $0x808] ss:$20 sps:$4 sm:$0xff]  }
 0x22c   :  { %3849 = vmatprep.subr.bf16.mxu1 %v4369_v2 }
 0x22e   :  { %3822 = vmatpush3.bf16.msra.mxu0 %v4370_v3 }
 0x22f   :  { %3850 = vmatpush3.bf16.msra.mxu1 %v4371_v0  ;;  %3823 = vmatprep.subr.bf16.mxu0 %v4372_v4 }
 0x230   :  { %3035 = vmatmul.mubr.bf16.gmra.mrb[28].mxu0 %v4695_v41  ;;  %3851 = vmatprep.subr.bf16.mxu1 %v4373_v5  ;;  %v4383_v41 = vld [vmem:[#allocation8 + $0x830] ss:$20 sps:$4 sm:$0xff]  }
 0x231   :  { %3084 = vmatmul.mubr.bf16.gmra.mrb[28].mxu1 %v4707_v55  ;;  %3124 = vmatprep.mubr.bf16.mxu0 %v4719_v9  ;;  %v4385_v55 = vld [vmem:[#allocation8 + $0x998] ss:$20 sps:$4 sm:$0xff]  }
 0x232   :  { %3824 = vmatpush3.bf16.msra.mxu0 %v4374_v7  ;;  %3173 = vmatprep.mubr.bf16.mxu1 %v4741_v46  ;;  %v4386_v9 = vld [vmem:[#allocation8 + $0x5d8] ss:$20 sps:$4 sm:$0xff]  }
 0x233   :  { %3852 = vmatpush3.bf16.msra.mxu1 %v4375_v11  ;;  %3825 = vmatprep.subr.bf16.mxu0 %v4376_v8  ;;  %v4387_v46 = vld [vmem:[#allocation8 + $0x858] ss:$20 sps:$4 sm:$0xff]  }
 0x234   :  { %3853 = vmatprep.subr.bf16.mxu1 %v4377_v23 }
 0x236   :  { %3826 = vmatpush3.bf16.msra.mxu0 %v4378_v47 }
 0x237   :  { %3854 = vmatpush3.bf16.msra.mxu1 %v4379_v58  ;;  %3827 = vmatprep.subr.bf16.mxu0 %v4380_v10 }
 0x238   :  { %3855 = vmatprep.subr.bf16.mxu1 %v4381_v12 }
 0x23a   :  { %3828 = vmatpush3.bf16.msra.mxu0 %v4382_v13 }
 0x23b   :  { %3856 = vmatpush3.bf16.msra.mxu1 %v4383_v41  ;;  %3829 = vmatprep.subr.bf16.mxu0 %v4384_v15 }
 0x23c   :  { %3857 = vmatprep.subr.bf16.mxu1 %v4385_v55 }
 0x23e   :  { %3830 = vmatpush3.bf16.msra.mxu0 %v4386_v9 }
 0x23f   :  { %3858 = vmatpush3.bf16.msra.mxu1 %v4387_v46  ;;  %3831 = vmatprep.subr.bf16.mxu0 %v4388_v16 }
 0x240   :  { %3859 = vmatprep.subr.bf16.mxu1 %v4389_v17 }
 0x242   :  { %3832 = vmatpush3.bf16.msra.mxu0 %v4390_v18 }
 0x243   :  { %3860 = vmatpush3.bf16.msra.mxu1 %v4391_v19  ;;  %3833 = vmatprep.subr.bf16.mxu0 %v4392_v20 }
 0x244   :  { %3861 = vmatprep.subr.bf16.mxu1 %v4393_v21 }
 0x246   :  { %3834 = vmatpush3.bf16.msra.mxu0 %v4394_v22 }
 0x247   :  { %3862 = vmatpush3.bf16.msra.mxu1 %v4395_v24 }
 0x249   :  { %3125 = vmatmul.mubr.bf16.vlgmr.msra.gmra.mrb[32].mxu0 %v4717_v6 }
 0x24a   :  { %3174 = vmatmul.mubr.bf16.vlgmr.msra.gmra.mrb[32].mxu1 %v4739_v45  ;;  %3132 = vmatprep.mubr.bf16.mxu0 %v4735_v43 }
 0x24b   :  { %3181 = vmatprep.mubr.bf16.mxu1 %v4753_v53 }
 0x251   :  { %3133 = vmatmul.mubr.bf16.gmra.mrb[36].mxu0 %v4731_v36 }
 0x252   :  { %3182 = vmatmul.mubr.bf16.gmra.mrb[36].mxu1 %v4751_v52 }
 0x2db   :  { %v2763_v25 = vpop.f32.mrb[16].mxu0  ;;  %v2975_v27 = vpop.f32.mrb[16].mxu1 }
 0x2dc   :  { %v3213_v28 = vrot.slane %v2975_v27, 6  ;;  %v2765_v29 = vpop.f32.mrb[17].mxu0  ;;  %v2977_v31 = vpop.f32.mrb[17].mxu1  ;;  %v3211_v45 = vrot.slane %v2763_v25, 6 }
 0x2dd   :  { %v3212_v33 = vrot.slane %v2765_v29, 6  ;;  %v3214_v34 = vrot.slane %v2977_v31, 6  ;;  %v2767_v54 = vpop.f32.mrb[18].mxu0  ;;  %v2979_v6 = vpop.f32.mrb[18].mxu1 }
 0x2de   :  { %v3263_v43 = vsel %vm3210_vm2, 0.0, %v3213_v28  ;;  %v3216_v35 = vrot.slane %v2767_v54, 6  ;;  %v3220_v53 = vrot.slane %v2979_v6, 6  ;;  %v2769_v37 = vpop.f32.mrb[19].mxu0  ;;  %v2981_v36 = vpop.f32.mrb[19].mxu1  ;;  %v3261_v30 = vsel %vm3210_vm2, 0.0, %v3211_v45 }
 0x2df   :  { %v3307_v38 = vrot.slane %v3263_v43, 2  ;;  %v3262_v52 = vsel %vm3210_vm2, 0.0, %v3212_v33  ;;  %v3218_v39 = vrot.slane %v2769_v37, 6  ;;  %v3264_v42 = vsel %vm3210_vm2, 0.0, %v3214_v34 }
 0x2e0   :  { %v3284_v40 = vrot.slane %v3262_v52, 1  ;;  %v3217_v56 = vsel %vm3210_vm2, %v3211_v45, %v3216_v35  ;;  %v3221_v44 = vsel %vm3210_vm2, %v3213_v28, %v3220_v53  ;;  %v3272_v48 = vsel %vm3210_vm2, %v3220_v53, 0.0 }
 0x2e1   :  { %v3308_v14 = vrot.slane %v3221_v44, 2  ;;  %v3219_v49 = vsel %vm3210_vm2, %v3212_v33, %v3218_v39  ;;  %v3271_v26 = vsel %vm3210_vm2, %v3218_v39, 0.0  ;;  %v3310_v50 = vrot.slane %v3272_v48, 2 }
 0x2e2   :  { %v3285_v51 = vrot.slane %v3219_v49, 1  ;;  %v3287_v57 = vrot.slane %v3271_v26, 1  ;;  %v3222_v59 = vrot.slane %v2981_v36, 6  ;;  %v3330_v60 = vrot.slane %v3264_v42, 3 }
 0x2e3   :  { %v3309_v32 = vsel %vm3306_vm3, %v3307_v38, %v3308_v14  ;;  %v2773_v61 = vpop.f32.mrb[20].mxu0  ;;  %v2985_v62 = vpop.f32.mrb[20].mxu1  ;;  %v3311_v63 = vsel %vm3306_vm3, %v3308_v14, %v3310_v50 }
 0x2e4   :  { %v3286_v1 = vsel %vm3283_vm4, %v3284_v40, %v3285_v51  ;;  %v3288_v2 = vsel %vm3283_vm4, %v3285_v51, %v3287_v57  ;;  %v3223_v3 = vsel %vm3210_vm2, %v3214_v34, %v3222_v59  ;;  %v2775_v0 = vpop.f32.mrb[21].mxu0  ;;  %v2987_v4 = vpop.f32.mrb[21].mxu1  ;;  %v3273_v11 = vsel %vm3210_vm2, %v3222_v59, 0.0 }
 0x2e5   :  { %v3298_v5 = vadd.f32 %v3286_v1, %v3261_v30  ;;  %v3299_v7 = vadd.f32 %v3288_v2, %v3217_v56  ;;  %v3331_v8 = vrot.slane %v3223_v3, 3  ;;  %v2777_v23 = vpop.f32.mrb[22].mxu0  ;;  %v2989_v47 = vpop.f32.mrb[22].mxu1  ;;  %v3333_v58 = vrot.slane %v3273_v11, 3 }
 0x2e6   :  { %v3226_v10 = vrot.slane %v2773_v61, 6  ;;  %v3228_v12 = vrot.slane %v2985_v62, 6  ;;  %v3227_v13 = vrot.slane %v2775_v0, 6  ;;  %v2779_v41 = vpop.f32.mrb[23].mxu0  ;;  %v2991_v15 = vpop.f32.mrb[23].mxu1  ;;  %v3229_v16 = vrot.slane %v2987_v4, 6 }
 0x2e7   :  { %v3321_v55 = vadd.f32 %v3309_v32, %v3298_v5  ;;  %v3322_v9 = vadd.f32 %v3311_v63, %v3299_v7  ;;  %v3332_v46 = vsel %vm3329_vm5, %v3330_v60, %v3331_v8  ;;  %v3334_v17 = vsel %vm3329_vm5, %v3331_v8, %v3333_v58 }
 0x2e8   :  { %v3268_v18 = vsel %vm3210_vm2, 0.0, %v3228_v12  ;;  %v3267_v19 = vsel %vm3210_vm2, 0.0, %v3227_v13  ;;  %v3266_v22 = vsel %vm3210_vm2, 0.0, %v3226_v10  ;;  %v3231_v24 = vrot.slane %v2777_v23, 6 }
 0x2e9   :  { %v4808_v20 = vadd.f32 %v3332_v46, %v3321_v55  ;;  %v4810_v21 = vadd.f32 %v3334_v17, %v3322_v9  ;;  %v3235_v25 = vrot.slane %v2989_v47, 6  ;;  %v3233_v27 = vrot.slane %v2779_v41, 6 }
 0x2ea   :  { %v3312_v28 = vrot.slane %v3268_v18, 2  ;;  %v3289_v29 = vrot.slane %v3267_v19, 1  ;;  %v3269_v31 = vsel %vm3210_vm2, 0.0, %v3229_v16  ;;  %v3237_v33 = vrot.slane %v2991_v15, 6 }
 0x2eb   :  { %v3232_v34 = vsel %vm3210_vm2, %v3226_v10, %v3231_v24  ;;  %v3236_v54 = vsel %vm3210_vm2, %v3228_v12, %v3235_v25  ;;  %v3276_v6 = vsel %vm3210_vm2, %v3235_v25, 0.0  ;;  %v3234_v45 = vsel %vm3210_vm2, %v3227_v13, %v3233_v27 }
 0x2ec   :  { %v3313_v43 = vrot.slane %v3236_v54, 2  ;;  %v3315_v35 = vrot.slane %v3276_v6, 2  ;;  %v3275_v53 = vsel %vm3210_vm2, %v3233_v27, 0.0  ;;  %v3290_v37 = vrot.slane %v3234_v45, 1 }
 0x2ed   :  { %v3335_v36 = vrot.slane %v3269_v31, 3  ;;  %v3292_v38 = vrot.slane %v3275_v53, 1  ;;  %v3238_v52 = vsel %vm3210_vm2, %v3229_v16, %v3237_v33  ;;  %v3277_v39 = vsel %vm3210_vm2, %v3237_v33, 0.0 }
 0x2ee   :  { %v3314_v40 = vsel %vm3306_vm3, %v3312_v28, %v3313_v43  ;;  %v3316_v42 = vsel %vm3306_vm3, %v3313_v43, %v3315_v35  ;;  %v3291_v56 = vsel %vm3283_vm4, %v3289_v29, %v3290_v37  ;;  %v3336_v44 = vrot.slane %v3238_v52, 3 }
 0x2ef   :  { %v3293_v48 = vsel %vm3283_vm4, %v3290_v37, %v3292_v38  ;;  %v3300_v14 = vadd.f32 %v3291_v56, %v3266_v22  ;;  %v3338_v49 = vrot.slane %v3277_v39, 3 }
 0x2f0   :  { %v3301_v26 = vadd.f32 %v3293_v48, %v3232_v34  ;;  %v3337_v50 = vsel %vm3329_vm5, %v3335_v36, %v3336_v44 }
 0x2f1   :  { %v3323_v51 = vadd.f32 %v3314_v40, %v3300_v14  ;;  %v3339_v57 = vsel %vm3329_vm5, %v3336_v44, %v3338_v49 }
 0x2f2   :  { %v3324_v59 = vadd.f32 %v3316_v42, %v3301_v26 }
 0x2f3   :  { %v4827_v30 = vadd.f32 %v3337_v50, %v3323_v51 }
 0x2f4   :  { %v4829_v60 = vadd.f32 %v3339_v57, %v3324_v59 }
 0x2fb   :  { %v3779_v32 = vpop.f32.mrb[24].mxu0 }
 0x2fc   :  { %v3807_v61 = vpop.f32.mrb[24].mxu1  ;;  %v3780_v62 = vpop.f32.mrb[25].mxu0 }
 0x2fd   :  { %v3781_v63 = vadd.f32 %v3780_v62, %v3779_v32  ;;  %v3808_v1 = vpop.f32.mrb[25].mxu1  ;;  %v3782_v2 = vpop.f32.mrb[26].mxu0 }
 0x2fe   :  { %v3809_v3 = vadd.f32 %v3808_v1, %v3807_v61  ;;  %v3810_v0 = vpop.f32.mrb[26].mxu1  ;;  %v3783_v4 = vpop.f32.mrb[27].mxu0 }
 0x2ff   :  { %v3784_v5 = vadd.f32 %v3783_v4, %v3782_v2  ;;  %v3811_v7 = vpop.f32.mrb[27].mxu1 }
 0x300   :  { %v3078_v11 = vadd.f32 %v3809_v3, %v3781_v63  ;;  %v3812_v8 = vadd.f32 %v3811_v7, %v3810_v0 }
 0x302   :  { %v3081_v23 = vadd.f32 %v3812_v8, %v3784_v5  ;;  %v3762_v5 = vld [vmem:[#allocation10] ss:$0 sm:$0xff] }
 0x303   :  { %v3785_v47 = vpop.f32.mrb[28].mxu0 }
 0x304   :  { %v3813_v58 = vpop.f32.mrb[28].mxu1  ;;  %v3786_v10 = vpop.f32.mrb[29].mxu0 }
 0x305   :  { %v3787_v12 = vadd.f32 %v3786_v10, %v3785_v47  ;;  %v3814_v13 = vpop.f32.mrb[29].mxu1  ;;  %v3788_v41 = vpop.f32.mrb[30].mxu0 }
 0x306   :  { %v3815_v15 = vadd.f32 %v3814_v13, %v3813_v58  ;;  %v3816_v55 = vpop.f32.mrb[30].mxu1  ;;  %v3789_v9 = vpop.f32.mrb[31].mxu0 }
 0x307   :  { %v3790_v46 = vadd.f32 %v3789_v9, %v3788_v41  ;;  %v3817_v16 = vpop.f32.mrb[31].mxu1 }
 0x308   :  { %v3086_v17 = vadd.f32 %v3815_v15, %v3787_v12  ;;  %v3818_v18 = vadd.f32 %v3817_v16, %v3816_v55 }
 0x30a   :  { %v3089_v19 = vadd.f32 %v3818_v18, %v3790_v46 }
 0x31c   :  { %v3835_v22 = vpop.f32.mrb[32].mxu0 }
 0x31d   :  { %v3863_v24 = vpop.f32.mrb[32].mxu1  ;;  %v3836_v25 = vpop.f32.mrb[33].mxu0 }
 0x31e   :  { %v3837_v27 = vadd.f32 %v3836_v25, %v3835_v22  ;;  %v3864_v28 = vpop.f32.mrb[33].mxu1  ;;  %v3838_v29 = vpop.f32.mrb[34].mxu0 }
 0x31f   :  { %v3865_v31 = vadd.f32 %v3864_v28, %v3863_v24  ;;  %v3866_v33 = vpop.f32.mrb[34].mxu1  ;;  %v3839_v34 = vpop.f32.mrb[35].mxu0 }
 0x320   :  { %v3127_v54 = vadd.f32 %v3837_v27, %v3078_v11  ;;  %v3840_v6 = vadd.f32 %v3839_v34, %v3838_v29  ;;  %v3867_v45 = vpop.f32.mrb[35].mxu1 }
 0x321   :  { %v3868_v43 = vadd.f32 %v3867_v45, %v3866_v33 }
 0x322   :  { %v3176_v35 = vadd.f32 %v3865_v31, %v3127_v54  ;;  %v3130_v53 = vadd.f32 %v3840_v6, %v3081_v23 }
 0x324   :  { %v3215_v37 = vrot.slane %v3176_v35, 6  ;;  %v3179_v36 = vadd.f32 %v3868_v43, %v3130_v53  ;;  %v3841_v38 = vpop.f32.mrb[36].mxu0 }
 0x325   :  { %v3869_v52 = vpop.f32.mrb[36].mxu1  ;;  %v3842_v39 = vpop.f32.mrb[37].mxu0 }
 0x326   :  { %v3265_v40 = vsel %vm3210_vm2, 0.0, %v3215_v37  ;;  %v3224_v42 = vrot.slane %v3179_v36, 6  ;;  %v3843_v56 = vadd.f32 %v3842_v39, %v3841_v38  ;;  %v3870_v44 = vpop.f32.mrb[37].mxu1  ;;  %v3844_v48 = vpop.f32.mrb[38].mxu0 }
 0x327   :  { %v3871_v14 = vadd.f32 %v3870_v44, %v3869_v52  ;;  %v3872_v49 = vpop.f32.mrb[38].mxu1  ;;  %v3845_v26 = vpop.f32.mrb[39].mxu0  ;;  %v3352_v61 = vrot.slane %v3265_v40, 4 }
 0x328   :  { %v3225_v50 = vsel %vm3210_vm2, %v3215_v37, %v3224_v42  ;;  %v3274_v51 = vsel %vm3210_vm2, %v3224_v42, 0.0  ;;  %v3135_v57 = vadd.f32 %v3843_v56, %v3086_v17  ;;  %v3846_v59 = vadd.f32 %v3845_v26, %v3844_v48  ;;  %v3873_v32 = vpop.f32.mrb[39].mxu1 }
 0x329   :  { %v3353_v62 = vrot.slane %v3225_v50, 4  ;;  %v3355_v63 = vrot.slane %v3274_v51, 4  ;;  %v3874_v1 = vadd.f32 %v3873_v32, %v3872_v49 }
 0x32a   :  { %v3184_v2 = vadd.f32 %v3871_v14, %v3135_v57  ;;  %v3138_v3 = vadd.f32 %v3846_v59, %v3089_v19 }
 0x32b   :  { %v3354_v0 = vsel %vm269_vm0, %v3352_v61, %v3353_v62  ;;  %v3356_v4 = vsel %vm269_vm0, %v3353_v62, %v3355_v63 }
 0x32c   :  { %v3366_v7 = vadd.f32 %v3354_v0, %v4808_v20  ;;  %v3367_v11 = vadd.f32 %v3356_v4, %v4810_v21  ;;  %v3230_v8 = vrot.slane %v3184_v2, 6  ;;  %v3187_v23 = vadd.f32 %v3874_v1, %v3138_v3 }
 0x32e   :  { %v3377_v47 = vadd.f32 %v3762_v5, %v3366_v7  ;;  %v3378_v58 = vadd.f32 %v3762_v5, %v3367_v11  ;;  %v3270_v10 = vsel %vm3210_vm2, 0.0, %v3230_v8  ;;  %v3239_v12 = vrot.slane %v3187_v23, 6 }
 0x32f   :  { %v3357_v15 = vrot.slane %v3270_v10, 4 }
 0x330   :  { %3382 = vst [vmem:[#allocation11 + $0x8] sm:$0xff] %v3378_v58  ;;  %3381 = vst [vmem:[#allocation11] sm:$0xff] %v3377_v47  ;;  %v3240_v13 = vsel %vm3210_vm2, %v3230_v8, %v3239_v12  ;;  %v3278_v41 = vsel %vm3210_vm2, %v3239_v12, 0.0 }
 0x331   :  { %v3358_v55 = vrot.slane %v3240_v13, 4  ;;  %v3360_v9 = vrot.slane %v3278_v41, 4 }
 0x333   :  { %v3359_v20 = vsel %vm269_vm0, %v3357_v15, %v3358_v55  ;;  %v3361_v21 = vsel %vm269_vm0, %v3358_v55, %v3360_v9 }
 0x334   :  { %v3368_v46 = vadd.f32 %v3359_v20, %v4827_v30  ;;  %v3369_v16 = vadd.f32 %v3361_v21, %v4829_v60 }
 0x336   :  { %v3379_v17 = vadd.f32 %v3762_v5, %v3368_v46  ;;  %v3380_v18 = vadd.f32 %v3762_v5, %v3369_v16 }
 0x338   :  { %3384 = vst [vmem:[#allocation11 + $0x18] sm:$0xff] %v3380_v18  ;;  %3383 = vst [vmem:[#allocation11 + $0x10] sm:$0xff] %v3379_v17 }
 0x339   :  { %4517 = shalt.err (!%p4514_p2)
}
 0x33a   :  { %s4518_s8 = scalar_lea.hbm %s4862_s5, 512 }
 0x33b   :  { %p4519_p3 = scmp.ne.s32.totalorder %s4862_s5, %s4518_s8  ;;  %p4522_p4 = scmp.lt.u32.totalorder %s4518_s8, %s4862_s5 }
 0x33d   :  { %p4524_p5 = pnand %p4522_p4, %p4519_p3 }
 0x33f   :  { %4527 = shalt.err (!%p4524_p5)
}
 0x340   :  { %s4549_s13 = smov 128   ;;  %s4550_s14 = smov 8  }
 0x341   :  { %3396 = dma.vmem_to_hbm [thread:$0]  %s3391_s3, 512, %s4862_s5, [#allocation4], %s4549_s13, %s4549_s13, %s4550_s14  }
 0x342   :  { %4534 = dma.done.wait [#allocation4], 512  }
 0x343   :  { %4535 = vsyncadd [#allocation4], 4294966784 }
 0x344   :  { %3400 = vsyncpa [#allocation3], 1 }
 0x345   :  { %3401 = vsyncpa [#allocation6], 1 }
 0x346   :  { %3402 = vsyncpa [#allocation9], 1 }
 0x347   :  { %3403 = vsyncpa [#allocation4], 1 }

</bundles_post_ra>
